<compile_context>
chip_gen: v7x
topology: tpu7x:2x2x1
jax: 0.10.0
libtpu: 0.0.40
codegen_flags: <defaults>
</compile_context>

<pallas_src>
import functools

import jax
import jax.numpy as jnp
from jax.experimental import pallas as pl
from jax.experimental.pallas import tpu as pltpu


_VMEM_BUDGET_BYTES = 8 * 1024 * 1024    # target per-stage working set
_VMEM_LIMIT_BYTES = 48 * 1024 * 1024    # explicit scoped-VMEM limit (< v7x 64 MiB)


def _round_up(x, m):
    return -(-x // m) * m


def _pick_tile_n(n_rows, bytes_per_row, cap=512):
    """Largest multiple-of-8 node tile that keeps the working set in budget."""
    tile = min(cap, _round_up(n_rows, 8))
    while tile > 8 and tile * bytes_per_row > _VMEM_BUDGET_BYTES:
        tile //= 2
    tile = max(8, (tile // 8) * 8)
    return min(tile, _round_up(n_rows, 8))


def _compiler_params():
    return pltpu.CompilerParams(
        dimension_semantics=("parallel",),
        vmem_limit_bytes=_VMEM_LIMIT_BYTES,
    )


def _resident_spec(shape):
    """Full-array VMEM block that stays resident across all grid steps."""
    if len(shape) == 2:
        return pl.BlockSpec(shape, lambda i: (0, 0))
    elif len(shape) == 3:
        return pl.BlockSpec(shape, lambda i: (0, 0, 0))
    raise ValueError(shape)


# ----------------------------------------------------------------------------
# Simple aggregation kernels (cat / max / sum).
#   Each kernel sees T node tiles [TILE_N, C] and writes one output tile.
# ----------------------------------------------------------------------------
def _cat_kernel(*refs):
    *x_refs, out_ref = refs
    # Build the concatenated tile in registers and emit a single lane-dense
    # store of the full (TILE_N, T*C) output block (no masked column stores).
    out_ref[...] = jnp.concatenate([r[...] for r in x_refs], axis=-1)


def _max_kernel(*refs):
    *x_refs, out_ref = refs
    acc = x_refs[0][...]
    for r in x_refs[1:]:
        acc = jnp.maximum(acc, r[...])
    out_ref[...] = acc


def _sum_kernel(*refs):
    *x_refs, out_ref = refs
    acc = x_refs[0][...].astype(jnp.float32)
    for r in x_refs[1:]:
        acc = acc + r[...].astype(jnp.float32)
    out_ref[...] = acc.astype(out_ref.dtype)


# ----------------------------------------------------------------------------
# LSTM-attention aggregation kernel.
#   refs (inputs):  x_0..x_{T-1}            [TILE_N, C] node tiles
#                   wih_f, wih_b            [4, C, H]   per-gate input weights
#                   whh_f, whh_b            [4, H, H]   per-gate hidden weights
#                   b_f,   b_b              [4, 1, H]   per-gate bias (b_ih+b_hh)
#                   attw_f, attw_b          [1, H]      attention weight halves
#                   attb                    [1]         attention bias (SMEM)
#   out_ref: [TILE_N, C]
# Gate order follows PyTorch LSTM: (i, f, g, o).  Weights are pre-split per
# gate so no lane-misaligned slicing of a [*, 4H] gates matrix is needed.
# ----------------------------------------------------------------------------
def _lstm_agg_kernel(*refs, num_layers):
    T = num_layers
    x_refs = refs[:T]
    (wih_f_ref, whh_f_ref, b_f_ref,
     wih_b_ref, whh_b_ref, b_b_ref,
     attw_f_ref, attw_b_ref, attb_ref, out_ref) = refs[T:]

    TN, C = x_refs[0].shape
    H = whh_f_ref.shape[-1]

    # Load each x tile once in f32 and build a [T*TN, C] slab so the input
    # projection is ONE big MXU-friendly matmul per gate (hoisted out of the
    # recurrence).
    xs32 = [x_refs[t][...].astype(jnp.float32) for t in range(T)]
    x_big = jnp.concatenate(xs32, axis=0)                       # [T*TN, C]

    def run_direction(wih_ref, whh_ref, b_ref, attw_ref, reverse):
        # Hoisted input projection (does not depend on h): 4 gates, big M.
        xp = [jnp.dot(x_big, wih_ref[k], preferred_element_type=jnp.float32)
              for k in range(4)]                                # each [T*TN, H]
        # Hoisted weight loads and bias broadcasts (JAX does not CSE these).
        whh = [whh_ref[k] for k in range(4)]                    # each [H, H]
        bias = [jnp.broadcast_to(b_ref[k], (TN, H)) for k in range(4)]
        attw = jnp.broadcast_to(attw_ref[...], (TN, H))

        h = jnp.zeros((TN, H), jnp.float32)
        c = jnp.zeros((TN, H), jnp.float32)
        scores = [None] * T
        order = range(T - 1, -1, -1) if reverse else range(T)
        for t in order:
            r0 = t * TN
            pre = [xp[k][r0:r0 + TN, :]
                   + jnp.dot(h, whh[k], preferred_element_type=jnp.float32)
                   + bias[k]
                   for k in range(4)]
            i_g = jax.nn.sigmoid(pre[0])
            f_g = jax.nn.sigmoid(pre[1])
            g_g = jnp.tanh(pre[2])
            o_g = jax.nn.sigmoid(pre[3])
            c = f_g * c + i_g * g_g
            h = o_g * jnp.tanh(c)
            # Attention score: elementwise multiply + lane reduction instead of
            # a width-1 MXU matmul (VPU/XLU are idle while MXU does whh dots).
            scores[t] = jnp.sum(h * attw, axis=-1, keepdims=True)   # [TN, 1]
        return scores

    s_f = run_direction(wih_f_ref, whh_f_ref, b_f_ref, attw_f_ref, reverse=False)
    s_b = run_direction(wih_b_ref, whh_b_ref, b_b_ref, attw_b_ref, reverse=True)

    attb = attb_ref[0]
    s = [s_f[t] + s_b[t] + attb for t in range(T)]               # [TN, 1] each

    # Softmax over the T layer scores, kept as [TN, 1] columns (no [TN, T]
    # concat / masked column slices of alpha).
    m = s[0]
    for t in range(1, T):
        m = jnp.maximum(m, s[t])
    e = [jnp.exp(s[t] - m) for t in range(T)]
    denom = e[0]
    for t in range(1, T):
        denom = denom + e[t]
    inv = 1.0 / denom

    out = (e[0] * inv) * xs32[0]
    for t in range(1, T):
        out = out + (e[t] * inv) * xs32[t]
    out_ref[...] = out.astype(out_ref.dtype)


# ----------------------------------------------------------------------------
# Wrapper module
# ----------------------------------------------------------------------------
class SphereSkipConnectionPallas:
    """JAX/Pallas port of SphereSkipConnection (modes: cat, max, sum, lstm)."""

    def __init__(self, mode, channels=None, num_layers=None, key=None):
        self.mode = mode.lower()
        assert self.mode in ['cat', 'max', 'sum', 'lstm']
        self.params = None
        if self.mode == 'lstm':
            assert channels is not None and num_layers is not None
            assert key is not None
            C = channels
            H = num_layers * channels // 2
            s_lstm = 1.0 / float(H) ** 0.5        # PyTorch LSTM init scale
            s_att = 1.0 / float(2 * H) ** 0.5     # PyTorch Linear init scale
            ks = jax.random.split(key, 11)

            def u(k, shape, s):
                return jax.random.uniform(k, shape, jnp.float32, -s, s)

            # Weights stored per gate (i, f, g, o), already transposed for
            # x @ W style matmuls; biases are b_ih + b_hh.
            self.params = dict(
                wih_f=u(ks[0], (4, C, H), s_lstm),
                whh_f=u(ks[1], (4, H, H), s_lstm),
                b_f=u(ks[2], (4, 1, H), s_lstm) + u(ks[3], (4, 1, H), s_lstm),
                wih_b=u(ks[4], (4, C, H), s_lstm),
                whh_b=u(ks[5], (4, H, H), s_lstm),
                b_b=u(ks[6], (4, 1, H), s_lstm) + u(ks[7], (4, 1, H), s_lstm),
                attw_f=u(ks[8], (1, H), s_att),
                attw_b=u(ks[9], (1, H), s_att),
                attb=u(ks[10], (1,), s_att),
            )
            self._H = H

    def __call__(self, xs):
        assert isinstance(xs, (list, tuple))
        T = len(xs)
        N, C = xs[0].shape
        dtype = xs[0].dtype
        itemsize = jnp.dtype(dtype).itemsize

        if self.mode in ('cat', 'max', 'sum'):
            out_cols = T * C if self.mode == 'cat' else C
            # double-buffered input tiles + double-buffered output tile
            bytes_per_row = 2 * (T * C + out_cols) * itemsize
            tn = _pick_tile_n(N, bytes_per_row, cap=512)
            grid = (pl.cdiv(N, tn),)
            in_specs = [pl.BlockSpec((tn, C), lambda i: (i, 0)) for _ in range(T)]
            out_specs = pl.BlockSpec((tn, out_cols), lambda i: (i, 0))
            kernel = {'cat': _cat_kernel,
                      'max': _max_kernel,
                      'sum': _sum_kernel}[self.mode]
            return pl.pallas_call(
                kernel,
                out_shape=jax.ShapeDtypeStruct((N, out_cols), dtype),
                grid=grid,
                in_specs=in_specs,
                out_specs=out_specs,
                compiler_params=_compiler_params(),
            )(*xs)

        # lstm
        p = self.params
        H = self._H
        # rough f32 working-set estimate per node row (pipelined tiles +
        # in-kernel intermediates: x slab, 4-gate input projections, h/c/gates)
        bytes_per_row = (2 * (T * C + C) + T * C + 4 * T * H + 16 * H) * 4
        tn = _pick_tile_n(N, bytes_per_row, cap=256)
        grid = (pl.cdiv(N, tn),)
        x_spec = pl.BlockSpec((tn, C), lambda i: (i, 0))
        in_specs = (
            [x_spec] * T
            + [
                _resident_spec(p['wih_f'].shape),
                _resident_spec(p['whh_f'].shape),
                _resident_spec(p['b_f'].shape),
                _resident_spec(p['wih_b'].shape),
                _resident_spec(p['whh_b'].shape),
                _resident_spec(p['b_b'].shape),
                _resident_spec(p['attw_f'].shape),
                _resident_spec(p['attw_b'].shape),
                pl.BlockSpec(memory_space=pltpu.MemorySpace.SMEM),  # attb scalar
            ]
        )
        out_specs = pl.BlockSpec((tn, C), lambda i: (i, 0))
        return pl.pallas_call(
            functools.partial(_lstm_agg_kernel, num_layers=T),
            out_shape=jax.ShapeDtypeStruct((N, C), dtype),
            grid=grid,
            in_specs=in_specs,
            out_specs=out_specs,
            compiler_params=_compiler_params(),
        )(*xs, p['wih_f'], p['whh_f'], p['b_f'],
          p['wih_b'], p['whh_b'], p['b_b'],
          p['attw_f'], p['attw_b'], p['attb'])

    def __repr__(self):
        return '{}({})'.format(self.__class__.__name__, self.mode)


# ----------------------------------------------------------------------------
# Pure-JAX reference for the lstm mode (numerical verification only).
# ----------------------------------------------------------------------------
def _lstm_reference(xs, p):
    x = jnp.stack(xs, axis=1)  # [N, T, C]
    N, T, C = x.shape
    H = p['whh_f'].shape[-1]

    def run(wih, whh, b, reverse):
        h = jnp.zeros((N, H), jnp.float32)
        c = jnp.zeros((N, H), jnp.float32)
        hs = [None] * T
        order = range(T - 1, -1, -1) if reverse else range(T)
        for t in order:
            g = [x[:, t] @ wih[k] + h @ whh[k] + b[k] for k in range(4)]
            i = jax.nn.sigmoid(g[0])
            f = jax.nn.sigmoid(g[1])
            gg = jnp.tanh(g[2])
            o = jax.nn.sigmoid(g[3])
            c = f * c + i * gg
            h = o * jnp.tanh(c)
            hs[t] = h
        return hs

    hf = run(p['wih_f'], p['whh_f'], p['b_f'], reverse=False)
    hb = run(p['wih_b'], p['whh_b'], p['b_b'], reverse=True)
    scores = jnp.stack(
        [(hf[t] * p['attw_f']).sum(-1) + (hb[t] * p['attw_b']).sum(-1)
         + p['attb'][0] for t in range(T)], axis=-1)             # [N, T]
    alpha = jax.nn.softmax(scores, axis=-1)
    return (x * alpha[:, :, None]).sum(axis=1)


if __name__ == "__main__":
    key = jax.random.PRNGKey(0)
    N, C, T = 2048, 32, 4   # nodes, channels, number of layer representations
    keys = jax.random.split(key, T + 1)
    xs = [jax.random.normal(keys[i], (N, C), jnp.float32) for i in range(T)]

    # cat
    out_cat = jax.block_until_ready(SphereSkipConnectionPallas('cat')(xs))
    assert out_cat.shape == (N, T * C)
    assert jnp.allclose(out_cat, jnp.concatenate(xs, axis=-1), atol=1e-6)

    # max
    out_max = jax.block_until_ready(SphereSkipConnectionPallas('max')(xs))
    assert jnp.allclose(out_max, jnp.max(jnp.stack(xs, -1), -1), atol=1e-6)

    # sum
    out_sum = jax.block_until_ready(SphereSkipConnectionPallas('sum')(xs))
    assert jnp.allclose(out_sum, jnp.sum(jnp.stack(xs, -1), -1), atol=1e-5)

    # lstm
    mod = SphereSkipConnectionPallas('lstm', channels=C, num_layers=T,
                                     key=keys[T])
    out_lstm = jax.block_until_ready(mod(xs))
    ref = _lstm_reference(xs, mod.params)
    assert out_lstm.shape == (N, C)
    max_err = float(jnp.max(jnp.abs(out_lstm - ref)))
    assert max_err < 2e-3, max_err

    print("KERNEL_OK")
</pallas_src>

<mosaic_0001>
module attributes {stable_mosaic.version = 11 : i64} {
  func.func @_cat_kernel(%arg0: i32, %arg1: memref<512x32xf32, #tpu.memory_space<vmem>>, %arg2: memref<512x32xf32, #tpu.memory_space<vmem>>, %arg3: memref<512x32xf32, #tpu.memory_space<vmem>>, %arg4: memref<512x32xf32, #tpu.memory_space<vmem>>, %arg5: memref<512x128xf32, #tpu.memory_space<vmem>>) attributes {dimension_semantics = [#tpu.dimension_semantics<parallel>], iteration_bounds = array<i64: 4>, scalar_prefetch = 0 : i64, scratch_operands = 0 : i64, tpu.core_type = #tpu.core_type<tc>, window_params = [{transform_indices = @transform_0, window_bounds = array<i64: 512, 32>}, {transform_indices = @transform_1, window_bounds = array<i64: 512, 32>}, {transform_indices = @transform_2, window_bounds = array<i64: 512, 32>}, {transform_indices = @transform_3, window_bounds = array<i64: 512, 32>}, {transform_indices = @transform_4, window_bounds = array<i64: 512, 128>}]} {
    %c0 = arith.constant 0 : index
    %c0_0 = arith.constant 0 : index
    %0 = vector.load %arg1[%c0, %c0_0] : memref<512x32xf32, #tpu.memory_space<vmem>>, vector<512x32xf32>
    %c0_1 = arith.constant 0 : index
    %c0_2 = arith.constant 0 : index
    %1 = vector.load %arg2[%c0_1, %c0_2] : memref<512x32xf32, #tpu.memory_space<vmem>>, vector<512x32xf32>
    %c0_3 = arith.constant 0 : index
    %c0_4 = arith.constant 0 : index
    %2 = vector.load %arg3[%c0_3, %c0_4] : memref<512x32xf32, #tpu.memory_space<vmem>>, vector<512x32xf32>
    %c0_5 = arith.constant 0 : index
    %c0_6 = arith.constant 0 : index
    %3 = vector.load %arg4[%c0_5, %c0_6] : memref<512x32xf32, #tpu.memory_space<vmem>>, vector<512x32xf32>
    %4 = tpu.concatenate %0, %1, %2, %3 in 1 : vector<512x32xf32>, vector<512x32xf32>, vector<512x32xf32>, vector<512x32xf32> -> vector<512x128xf32>
    %c0_7 = arith.constant 0 : index
    %c0_8 = arith.constant 0 : index
    %5 = vector.load %arg5[%c0_7, %c0_8] : memref<512x128xf32, #tpu.memory_space<vmem>>, vector<512x128xf32>
    tpu.vector_store %arg5[%c0_7, %c0_8], %4 {strides = array<i32>} : memref<512x128xf32, #tpu.memory_space<vmem>>, vector<512x128xf32>,
    return
  }
  func.func @transform_0(%arg0: i32) -> (i32, i32) {
    %c0_i32 = arith.constant 0 : i32
    %c0_i32_0 = arith.constant 0 : i32
    return %arg0, %c0_i32 : i32, i32
  }
  func.func @transform_1(%arg0: i32) -> (i32, i32) {
    %c0_i32 = arith.constant 0 : i32
    %c0_i32_0 = arith.constant 0 : i32
    return %arg0, %c0_i32 : i32, i32
  }
  func.func @transform_2(%arg0: i32) -> (i32, i32) {
    %c0_i32 = arith.constant 0 : i32
    %c0_i32_0 = arith.constant 0 : i32
    return %arg0, %c0_i32 : i32, i32
  }
  func.func @transform_3(%arg0: i32) -> (i32, i32) {
    %c0_i32 = arith.constant 0 : i32
    %c0_i32_0 = arith.constant 0 : i32
    return %arg0, %c0_i32 : i32, i32
  }
  func.func @transform_4(%arg0: i32) -> (i32, i32) {
    %c0_i32 = arith.constant 0 : i32
    %c0_i32_0 = arith.constant 0 : i32
    return %arg0, %c0_i32 : i32, i32
  }
}

</mosaic_0001>

<bundles_post_ra>
// kernel: tpu_custom_call.1
= control target key start
LH: loop header
LB: loop body
LE: loop exit
PB: predicated region body
PF: predicated region fallthrough
CT: control target
= control target key end

     0   :  { %9 = vsyncpa [#allocation3], 0  ;;  %s3038_s0 = inlined_call_operand.vmem [shape: f32[2048,32], index: 0, kind: input, shape index: {}]   ;;  %s3039_s1 = inlined_call_operand.vmem [shape: f32[2048,32], index: 1, kind: input, shape index: {}]   ;;  %s3040_s2 = inlined_call_operand.vmem [shape: f32[2048,32], index: 2, kind: input, shape index: {}]   ;;  %s3041_s3 = inlined_call_operand.vmem [shape: f32[2048,32], index: 3, kind: input, shape index: {}]   ;;  %s3042_s4 = inlined_call_operand.hbm [shape: f32[2048,128], index: 4, kind: output, shape index: {}]  }
   0x1   :  { %11 = vsyncpa [#allocation3 + $0x1], 0  ;;  %s1818_s15 = smov 0   ;;  %s1820_s16 = smov 0  }
   0x2   :  { %s1822_s17 = smov 0   ;;  %s1824_s18 = smov 0  }
   0x3 LB: > { %s1839_s19 = sadd.s32 4294967295, %s1785_s18   ;;  %s1660_s20 = sadd.s32 4294967294, %s1785_s18   ;;  %s1785_s18 = sphi %s1824_s18, %s3200_s18   ;;  %s1781_s17 = sphi %s1822_s17, %s3199_s17   ;;  %s1777_s16 = sphi %s1820_s16, %s3198_s16   ;;  %s1773_s15 = sphi %s1818_s15, %s3197_s15  }
   0x4   : > { %s1843_s21 = sadd.s32 1, %s1785_s18   ;;  %s128_s22 = sadd.s32 1, %s1781_s17 }
   0x5   : > { %s125_s23 = ssub.s32 %s1785_s18, %s1843_s21  ;;  %p138_p0 = scmp.ne.s32.totalorder %s1781_s17, %s1777_s16 }
   0x6   : > { %p126_p1 = scmp.eq.s32.totalorder %s125_s23, 0  ;;  %p139_p2 = scmp.eq.s32.totalorder %s1839_s19, 3 }
   0x7   : > { %p144_p3 = scmp.ne.s32.totalorder %s1777_s16, %s1773_s15  ;;  %p145_p4 = scmp.eq.s32.totalorder %s1660_s20, 3 }
   0x8   : > { %s1854_s24 = scalar_select %p126_p1, %s1781_s17, %s128_s22  }
   0x9   : > { %p1856_p5 = por %p139_p2, %p138_p0  ;;  %p1860_p6 = por %p145_p4, %p144_p3 }
   0xa   : > { %p1663_p7 = scmp.ge.s32.totalorder %s1785_s18, 1  ;;  %p199_p8 = scmp.lt.s32.totalorder %s1785_s18, 5 }
   0xc   : > { %p200_p9 = pnand %p1663_p7, %p199_p8 }
   0xe   : > { %203 = sbr.rel (%p200_p9) target bundleno = 539 (0x21b), region = 36 }
  0x15   : > { %s1665_s27 = sshll.u32 %s1839_s19, 6  ;;  %s1787_s6 = smov 32   ;;  %vm1289_vm0 = vcmask 261120   ;;  %vm1354_vm1 = vcmask 523264   ;;  %vm1419_vm2 = vcmask 785408  }
  0x16   : > { %p241_p10 = scmp.lt.s32.totalorder %s1665_s27, 255  ;;  %s1788_s10 = smov 64  }
  0x17   : > { %s1789_s14 = smov 96   ;;  %s1678_s30 = sshll.u32 %s1839_s19, 13 }
  0x18   : > { %s3202_s27 = smov (!%p241_p10, %s1665_s27), 255  ;;  %s2983_s19 = scalar_lea.hbm %s3042_s4, %s1678_s30 }
  0x19   : > { %s1867_s28 = sshll.u32 %s3202_s27, 3  ;;  %s237_s27 = sand.u32 1, %s1777_s16  }
  0x1a   : > { %s1873_s5 = scalar_lea.vmem %s3039_s1, %s1867_s28  ;;  %s2017_s9 = scalar_lea.vmem %s3040_s2, %s1867_s28 }
  0x1b   : > { %v331_v0 = vld [vmem:[%s1873_s5 + $0x10] sm:$0xff]  ;;  %v329_v1 = vld [vmem:[%s1873_s5] sm:$0xff]  ;;  %v332_v2 = vld [vmem:[%s1873_s5 + $0x18] sm:$0xff]  ;;  %s2279_s13 = scalar_lea.vmem %s3041_s3, %s1867_s28  ;;  %s2509_s23 = scalar_lea.vmem %s3038_s0, %s1867_s28 }
  0x1c   : > { %589 = vrot.lane.b32.xlu1 %v331_v0, %s1787_s6  ;;  %585 = vrot.lane.b32.xlu0 %v329_v1, %s1787_s6  ;;  %v330_v3 = vld [vmem:[%s1873_s5 + $0x8] sm:$0xff]  ;;  %v333_v5 = vld [vmem:[%s1873_s5 + $0x20] sm:$0xff]  ;;  %s1664_s28 = sshll.u32 %s237_s27, 9  ;;  %s2997_s8 = scalar_lea.sflag [#allocation3], %s237_s27 }
  0x1d   : > { %v334_v4 = vld [vmem:[%s1873_s5 + $0x28] sm:$0xff]  ;;  %v336_v6 = vld [vmem:[%s1873_s5 + $0x38] sm:$0xff]  ;;  %v335_v7 = vld [vmem:[%s1873_s5 + $0x30] sm:$0xff]  ;;  %s2540_s29 = scalar_lea.vmem [#allocation2], %s1664_s28 }
  0x1e   : > { %v338_v8 = vld [vmem:[%s1873_s5 + $0x48] sm:$0xff]  ;;  %v337_v9 = vld [vmem:[%s1873_s5 + $0x40] sm:$0xff]  ;;  %v340_v10 = vld [vmem:[%s1873_s5 + $0x58] sm:$0xff] }
  0x1f   : > { %v339_v11 = vld [vmem:[%s1873_s5 + $0x50] sm:$0xff]  ;;  %v342_v12 = vld [vmem:[%s1873_s5 + $0x68] sm:$0xff]  ;;  %v341_v13 = vld [vmem:[%s1873_s5 + $0x60] sm:$0xff] }
  0x20   : > { %591 = vrot.lane.b32.xlu1 %v332_v2, %s1787_s6  ;;  %587 = vrot.lane.b32.xlu0 %v330_v3, %s1787_s6  ;;  %v344_v14 = vld [vmem:[%s1873_s5 + $0x78] sm:$0xff]  ;;  %v343_v15 = vld [vmem:[%s1873_s5 + $0x70] sm:$0xff] }
  0x21   : > { %v346_v16 = vld [vmem:[%s1873_s5 + $0x88] sm:$0xff]  ;;  %v345_v17 = vld [vmem:[%s1873_s5 + $0x80] sm:$0xff]  ;;  %v348_v18 = vld [vmem:[%s1873_s5 + $0x98] sm:$0xff] }
  0x22   : > { %v347_v19 = vld [vmem:[%s1873_s5 + $0x90] sm:$0xff]  ;;  %v350_v20 = vld [vmem:[%s1873_s5 + $0xa8] sm:$0xff]  ;;  %v349_v21 = vld [vmem:[%s1873_s5 + $0xa0] sm:$0xff] }
  0x23   : > { %v352_v22 = vld [vmem:[%s1873_s5 + $0xb8] sm:$0xff]  ;;  %v351_v23 = vld [vmem:[%s1873_s5 + $0xb0] sm:$0xff]  ;;  %v354_v24 = vld [vmem:[%s1873_s5 + $0xc8] sm:$0xff] }
  0x24   : > { %595 = vrot.lane.b32.xlu1 %v334_v4, %s1787_s6  ;;  %593 = vrot.lane.b32.xlu0 %v333_v5, %s1787_s6  ;;  %v353_v25 = vld [vmem:[%s1873_s5 + $0xc0] sm:$0xff]  ;;  %v356_v26 = vld [vmem:[%s1873_s5 + $0xd8] sm:$0xff] }
  0x25   : > { %v355_v27 = vld [vmem:[%s1873_s5 + $0xd0] sm:$0xff]  ;;  %v358_v28 = vld [vmem:[%s1873_s5 + $0xe8] sm:$0xff]  ;;  %v357_v29 = vld [vmem:[%s1873_s5 + $0xe0] sm:$0xff] }
  0x26   : > { %v360_v30 = vld [vmem:[%s1873_s5 + $0xf8] sm:$0xff]  ;;  %v359_v31 = vld [vmem:[%s1873_s5 + $0xf0] sm:$0xff]  ;;  %v362_v32 = vld [vmem:[%s1873_s5 + $0x108] sm:$0xff] }
  0x27   : > { %v361_v33 = vld [vmem:[%s1873_s5 + $0x100] sm:$0xff]  ;;  %v364_v34 = vld [vmem:[%s1873_s5 + $0x118] sm:$0xff]  ;;  %v363_v35 = vld [vmem:[%s1873_s5 + $0x110] sm:$0xff] }
  0x28   : > { %599 = vrot.lane.b32.xlu1 %v336_v6, %s1787_s6  ;;  %597 = vrot.lane.b32.xlu0 %v335_v7, %s1787_s6  ;;  %v366_v36 = vld [vmem:[%s1873_s5 + $0x128] sm:$0xff]  ;;  %v365_v37 = vld [vmem:[%s1873_s5 + $0x120] sm:$0xff] }
  0x29   : > { %v368_v38 = vld [vmem:[%s1873_s5 + $0x138] sm:$0xff]  ;;  %v367_v39 = vld [vmem:[%s1873_s5 + $0x130] sm:$0xff]  ;;  %v370_v40 = vld [vmem:[%s1873_s5 + $0x148] sm:$0xff] }
  0x2a   : > { %v369_v41 = vld [vmem:[%s1873_s5 + $0x140] sm:$0xff]  ;;  %v372_v42 = vld [vmem:[%s1873_s5 + $0x158] sm:$0xff]  ;;  %v371_v43 = vld [vmem:[%s1873_s5 + $0x150] sm:$0xff] }
  0x2b   : > { %v374_v44 = vld [vmem:[%s1873_s5 + $0x168] sm:$0xff]  ;;  %v373_v45 = vld [vmem:[%s1873_s5 + $0x160] sm:$0xff]  ;;  %v376_v46 = vld [vmem:[%s1873_s5 + $0x178] sm:$0xff] }
  0x2c   : > { %603 = vrot.lane.b32.xlu1 %v338_v8, %s1787_s6  ;;  %601 = vrot.lane.b32.xlu0 %v337_v9, %s1787_s6  ;;  %v375_v47 = vld [vmem:[%s1873_s5 + $0x170] sm:$0xff]  ;;  %v378_v48 = vld [vmem:[%s1873_s5 + $0x188] sm:$0xff] }
  0x2d   : > { %v377_v49 = vld [vmem:[%s1873_s5 + $0x180] sm:$0xff]  ;;  %v380_v50 = vld [vmem:[%s1873_s5 + $0x198] sm:$0xff]  ;;  %v379_v51 = vld [vmem:[%s1873_s5 + $0x190] sm:$0xff] }
  0x2e   : > { %v382_v52 = vld [vmem:[%s1873_s5 + $0x1a8] sm:$0xff]  ;;  %v381_v53 = vld [vmem:[%s1873_s5 + $0x1a0] sm:$0xff]  ;;  %v384_v54 = vld [vmem:[%s1873_s5 + $0x1b8] sm:$0xff] }
  0x2f   : > { %v383_v55 = vld [vmem:[%s1873_s5 + $0x1b0] sm:$0xff]  ;;  %v386_v56 = vld [vmem:[%s1873_s5 + $0x1c8] sm:$0xff]  ;;  %v385_v57 = vld [vmem:[%s1873_s5 + $0x1c0] sm:$0xff] }
  0x30   : > { %607 = vrot.lane.b32.xlu1 %v340_v10, %s1787_s6  ;;  %605 = vrot.lane.b32.xlu0 %v339_v11, %s1787_s6  ;;  %v388_v58 = vld [vmem:[%s1873_s5 + $0x1d8] sm:$0xff]  ;;  %v387_v59 = vld [vmem:[%s1873_s5 + $0x1d0] sm:$0xff] }
  0x31   : > { %v390_v62 = vld [vmem:[%s1873_s5 + $0x1e8] sm:$0xff]  ;;  %v389_v63 = vld [vmem:[%s1873_s5 + $0x1e0] sm:$0xff]  ;;  %v392_v2 = vld [vmem:[%s1873_s5 + $0x1f8] sm:$0xff] }
  0x32   : > { %v391_v3 = vld [vmem:[%s1873_s5 + $0x1f0] sm:$0xff]  ;;  %v394_v6 = vld [vmem:[%s2017_s9 + $0x8] sm:$0xff]  ;;  %v393_v7 = vld [vmem:[%s2017_s9] sm:$0xff]  ;;  %s1562_s5 = sshll.u32 %s2540_s29, 4  ;;  %s2985_s5 = int_to_ptr.vmem [resolvable:$true] %s1562_s5 }
  0x33   : > { %v396_v10 = vld [vmem:[%s2017_s9 + $0x18] sm:$0xff]  ;;  %v395_v11 = vld [vmem:[%s2017_s9 + $0x10] sm:$0xff] }
  0x34   : > { %611 = vrot.lane.b32.xlu1 %v342_v12, %s1787_s6  ;;  %609 = vrot.lane.b32.xlu0 %v341_v13, %s1787_s6 }
  0x38   : > { %615 = vrot.lane.b32.xlu1 %v344_v14, %s1787_s6  ;;  %613 = vrot.lane.b32.xlu0 %v343_v15, %s1787_s6  ;;  %v398_v14 = vld [vmem:[%s2017_s9 + $0x28] sm:$0xff]  ;;  %v397_v15 = vld [vmem:[%s2017_s9 + $0x20] sm:$0xff] }
  0x3c   : > { %619 = vrot.lane.b32.xlu1 %v346_v16, %s1787_s6  ;;  %617 = vrot.lane.b32.xlu0 %v345_v17, %s1787_s6 }
  0x40   : > { %623 = vrot.lane.b32.xlu1 %v348_v18, %s1787_s6  ;;  %621 = vrot.lane.b32.xlu0 %v347_v19, %s1787_s6  ;;  %v400_v18 = vld [vmem:[%s2017_s9 + $0x38] sm:$0xff]  ;;  %v399_v19 = vld [vmem:[%s2017_s9 + $0x30] sm:$0xff] }
  0x44   : > { %627 = vrot.lane.b32.xlu1 %v350_v20, %s1787_s6  ;;  %625 = vrot.lane.b32.xlu0 %v349_v21, %s1787_s6 }
  0x48   : > { %631 = vrot.lane.b32.xlu1 %v352_v22, %s1787_s6  ;;  %629 = vrot.lane.b32.xlu0 %v351_v23, %s1787_s6  ;;  %v402_v22 = vld [vmem:[%s2017_s9 + $0x48] sm:$0xff]  ;;  %v401_v23 = vld [vmem:[%s2017_s9 + $0x40] sm:$0xff] }
  0x4c   : > { %635 = vrot.lane.b32.xlu1 %v354_v24, %s1787_s6  ;;  %633 = vrot.lane.b32.xlu0 %v353_v25, %s1787_s6 }
  0x50   : > { %639 = vrot.lane.b32.xlu1 %v356_v26, %s1787_s6  ;;  %637 = vrot.lane.b32.xlu0 %v355_v27, %s1787_s6  ;;  %v404_v26 = vld [vmem:[%s2017_s9 + $0x58] sm:$0xff]  ;;  %v403_v27 = vld [vmem:[%s2017_s9 + $0x50] sm:$0xff] }
  0x54   : > { %643 = vrot.lane.b32.xlu1 %v358_v28, %s1787_s6  ;;  %641 = vrot.lane.b32.xlu0 %v357_v29, %s1787_s6 }
  0x58   : > { %647 = vrot.lane.b32.xlu1 %v360_v30, %s1787_s6  ;;  %645 = vrot.lane.b32.xlu0 %v359_v31, %s1787_s6  ;;  %v406_v30 = vld [vmem:[%s2017_s9 + $0x68] sm:$0xff]  ;;  %v405_v31 = vld [vmem:[%s2017_s9 + $0x60] sm:$0xff] }
  0x5c   : > { %651 = vrot.lane.b32.xlu1 %v362_v32, %s1787_s6  ;;  %649 = vrot.lane.b32.xlu0 %v361_v33, %s1787_s6 }
  0x60   : > { %655 = vrot.lane.b32.xlu1 %v364_v34, %s1787_s6  ;;  %653 = vrot.lane.b32.xlu0 %v363_v35, %s1787_s6  ;;  %v408_v34 = vld [vmem:[%s2017_s9 + $0x78] sm:$0xff]  ;;  %v407_v35 = vld [vmem:[%s2017_s9 + $0x70] sm:$0xff] }
  0x64   : > { %659 = vrot.lane.b32.xlu1 %v366_v36, %s1787_s6  ;;  %657 = vrot.lane.b32.xlu0 %v365_v37, %s1787_s6 }
  0x68   : > { %663 = vrot.lane.b32.xlu1 %v368_v38, %s1787_s6  ;;  %661 = vrot.lane.b32.xlu0 %v367_v39, %s1787_s6  ;;  %v410_v38 = vld [vmem:[%s2017_s9 + $0x88] sm:$0xff]  ;;  %v409_v39 = vld [vmem:[%s2017_s9 + $0x80] sm:$0xff] }
  0x6c   : > { %667 = vrot.lane.b32.xlu1 %v370_v40, %s1787_s6  ;;  %665 = vrot.lane.b32.xlu0 %v369_v41, %s1787_s6 }
  0x70   : > { %671 = vrot.lane.b32.xlu1 %v372_v42, %s1787_s6  ;;  %669 = vrot.lane.b32.xlu0 %v371_v43, %s1787_s6  ;;  %v412_v42 = vld [vmem:[%s2017_s9 + $0x98] sm:$0xff]  ;;  %v411_v43 = vld [vmem:[%s2017_s9 + $0x90] sm:$0xff] }
  0x74   : > { %675 = vrot.lane.b32.xlu1 %v374_v44, %s1787_s6  ;;  %673 = vrot.lane.b32.xlu0 %v373_v45, %s1787_s6 }
  0x78   : > { %679 = vrot.lane.b32.xlu1 %v376_v46, %s1787_s6  ;;  %677 = vrot.lane.b32.xlu0 %v375_v47, %s1787_s6  ;;  %v414_v46 = vld [vmem:[%s2017_s9 + $0xa8] sm:$0xff]  ;;  %v413_v47 = vld [vmem:[%s2017_s9 + $0xa0] sm:$0xff] }
  0x7c   : > { %683 = vrot.lane.b32.xlu1 %v378_v48, %s1787_s6  ;;  %681 = vrot.lane.b32.xlu0 %v377_v49, %s1787_s6 }
  0x80   : > { %687 = vrot.lane.b32.xlu1 %v380_v50, %s1787_s6  ;;  %685 = vrot.lane.b32.xlu0 %v379_v51, %s1787_s6  ;;  %v416_v50 = vld [vmem:[%s2017_s9 + $0xb8] sm:$0xff]  ;;  %v415_v51 = vld [vmem:[%s2017_s9 + $0xb0] sm:$0xff] }
  0x84   : > { %691 = vrot.lane.b32.xlu1 %v382_v52, %s1787_s6  ;;  %689 = vrot.lane.b32.xlu0 %v381_v53, %s1787_s6 }
  0x88   : > { %695 = vrot.lane.b32.xlu1 %v384_v54, %s1787_s6  ;;  %693 = vrot.lane.b32.xlu0 %v383_v55, %s1787_s6  ;;  %v418_v54 = vld [vmem:[%s2017_s9 + $0xc8] sm:$0xff]  ;;  %v417_v55 = vld [vmem:[%s2017_s9 + $0xc0] sm:$0xff] }
  0x8c   : > { %699 = vrot.lane.b32.xlu1 %v386_v56, %s1787_s6  ;;  %697 = vrot.lane.b32.xlu0 %v385_v57, %s1787_s6 }
  0x8e   : > { %v1993_v60 = vpop.permute.xlu1 %589  ;;  %v1995_v61 = vpop.permute.xlu0 %585 }
  0x90   : > { %703 = vrot.lane.b32.xlu1 %v388_v58, %s1787_s6  ;;  %701 = vrot.lane.b32.xlu0 %v387_v59, %s1787_s6  ;;  %v420_v58 = vld [vmem:[%s2017_s9 + $0xd8] sm:$0xff]  ;;  %v419_v59 = vld [vmem:[%s2017_s9 + $0xd0] sm:$0xff] }
  0x92   : > { %v2001_v0 = vpop.permute.xlu1 %591  ;;  %v2003_v1 = vpop.permute.xlu0 %587 }
  0x94   : > { %707 = vrot.lane.b32.xlu1 %v390_v62, %s1787_s6  ;;  %705 = vrot.lane.b32.xlu0 %v389_v63, %s1787_s6 }
  0x96   : > { %v2009_v4 = vpop.permute.xlu1 %595  ;;  %v2011_v5 = vpop.permute.xlu0 %593 }
  0x98   : > { %711 = vrot.lane.b32.xlu1 %v392_v2, %s1787_s6  ;;  %709 = vrot.lane.b32.xlu0 %v391_v3, %s1787_s6  ;;  %v422_v2 = vld [vmem:[%s2017_s9 + $0xe8] sm:$0xff]  ;;  %v421_v3 = vld [vmem:[%s2017_s9 + $0xe0] sm:$0xff] }
  0x9a   : > { %v2023_v8 = vpop.permute.xlu1 %599  ;;  %v2025_v9 = vpop.permute.xlu0 %597 }
  0x9c   : > { %843 = vrot.lane.b32.xlu1 %v394_v6, %s1788_s10  ;;  %841 = vrot.lane.b32.xlu0 %v393_v7, %s1788_s10 }
  0x9e   : > { %v2031_v12 = vpop.permute.xlu1 %603  ;;  %v2033_v13 = vpop.permute.xlu0 %601 }
  0xa0   : > { %847 = vrot.lane.b32.xlu1 %v396_v10, %s1788_s10  ;;  %845 = vrot.lane.b32.xlu0 %v395_v11, %s1788_s10  ;;  %v424_v10 = vld [vmem:[%s2017_s9 + $0xf8] sm:$0xff]  ;;  %v423_v11 = vld [vmem:[%s2017_s9 + $0xf0] sm:$0xff] }
  0xa2   : > { %v2039_v16 = vpop.permute.xlu1 %607  ;;  %v2041_v17 = vpop.permute.xlu0 %605 }
  0xa4   : > { %851 = vrot.lane.b32.xlu1 %v398_v14, %s1788_s10  ;;  %849 = vrot.lane.b32.xlu0 %v397_v15, %s1788_s10 }
  0xa6   : > { %v2047_v20 = vpop.permute.xlu1 %611  ;;  %v2049_v21 = vpop.permute.xlu0 %609 }
  0xa8   : > { %855 = vrot.lane.b32.xlu1 %v400_v18, %s1788_s10  ;;  %853 = vrot.lane.b32.xlu0 %v399_v19, %s1788_s10  ;;  %v426_v18 = vld [vmem:[%s2017_s9 + $0x108] sm:$0xff]  ;;  %v425_v19 = vld [vmem:[%s2017_s9 + $0x100] sm:$0xff] }
  0xaa   : > { %v2055_v24 = vpop.permute.xlu1 %615  ;;  %v2057_v25 = vpop.permute.xlu0 %613 }
  0xac   : > { %859 = vrot.lane.b32.xlu1 %v402_v22, %s1788_s10  ;;  %857 = vrot.lane.b32.xlu0 %v401_v23, %s1788_s10 }
  0xae   : > { %v2063_v28 = vpop.permute.xlu1 %619  ;;  %v2065_v29 = vpop.permute.xlu0 %617 }
  0xb0   : > { %863 = vrot.lane.b32.xlu1 %v404_v26, %s1788_s10  ;;  %861 = vrot.lane.b32.xlu0 %v403_v27, %s1788_s10  ;;  %v428_v26 = vld [vmem:[%s2017_s9 + $0x118] sm:$0xff]  ;;  %v427_v27 = vld [vmem:[%s2017_s9 + $0x110] sm:$0xff] }
  0xb2   : > { %v2071_v32 = vpop.permute.xlu1 %623  ;;  %v2073_v33 = vpop.permute.xlu0 %621 }
  0xb4   : > { %867 = vrot.lane.b32.xlu1 %v406_v30, %s1788_s10  ;;  %865 = vrot.lane.b32.xlu0 %v405_v31, %s1788_s10 }
  0xb6   : > { %v2079_v36 = vpop.permute.xlu1 %627  ;;  %v2081_v37 = vpop.permute.xlu0 %625 }
  0xb8   : > { %871 = vrot.lane.b32.xlu1 %v408_v34, %s1788_s10  ;;  %869 = vrot.lane.b32.xlu0 %v407_v35, %s1788_s10  ;;  %v430_v34 = vld [vmem:[%s2017_s9 + $0x128] sm:$0xff]  ;;  %v429_v35 = vld [vmem:[%s2017_s9 + $0x120] sm:$0xff] }
  0xba   : > { %v2087_v40 = vpop.permute.xlu1 %631  ;;  %v2089_v41 = vpop.permute.xlu0 %629 }
  0xbc   : > { %875 = vrot.lane.b32.xlu1 %v410_v38, %s1788_s10  ;;  %873 = vrot.lane.b32.xlu0 %v409_v39, %s1788_s10 }
  0xbe   : > { %v2095_v44 = vpop.permute.xlu1 %635  ;;  %v2097_v45 = vpop.permute.xlu0 %633 }
  0xc0   : > { %879 = vrot.lane.b32.xlu1 %v412_v42, %s1788_s10  ;;  %877 = vrot.lane.b32.xlu0 %v411_v43, %s1788_s10  ;;  %v432_v42 = vld [vmem:[%s2017_s9 + $0x138] sm:$0xff]  ;;  %v431_v43 = vld [vmem:[%s2017_s9 + $0x130] sm:$0xff] }
  0xc2   : > { %v2103_v48 = vpop.permute.xlu1 %639  ;;  %v2105_v49 = vpop.permute.xlu0 %637 }
  0xc3   : > { %3045 = vst [vmem:[#allocation5_spill] sm:$0xff] %v2103_v48  ;;  %3046 = vst [vmem:[#allocation6_spill] sm:$0xff] %v2105_v49 }
  0xc4   : > { %883 = vrot.lane.b32.xlu1 %v414_v46, %s1788_s10  ;;  %881 = vrot.lane.b32.xlu0 %v413_v47, %s1788_s10 }
  0xc6   : > { %v2111_v52 = vpop.permute.xlu1 %643  ;;  %v2113_v53 = vpop.permute.xlu0 %641 }
  0xc7   : > { %3047 = vst [vmem:[#allocation7_spill] sm:$0xff] %v2111_v52  ;;  %3048 = vst [vmem:[#allocation8_spill] sm:$0xff] %v2113_v53  ;;  %v481_v52 = vld [vmem:[%s2279_s13 + $0xc0] sm:$0xff] }
  0xc8   : > { %887 = vrot.lane.b32.xlu1 %v416_v50, %s1788_s10  ;;  %885 = vrot.lane.b32.xlu0 %v415_v51, %s1788_s10  ;;  %v434_v50 = vld [vmem:[%s2017_s9 + $0x148] sm:$0xff]  ;;  %v433_v51 = vld [vmem:[%s2017_s9 + $0x140] sm:$0xff] }
  0xca   : > { %v2119_v56 = vpop.permute.xlu1 %647  ;;  %v2121_v57 = vpop.permute.xlu0 %645 }
  0xcb   : > { %3049 = vst [vmem:[#allocation9_spill] sm:$0xff] %v2119_v56  ;;  %3050 = vst [vmem:[#allocation10_spill] sm:$0xff] %v2121_v57  ;;  %v479_v56 = vld [vmem:[%s2279_s13 + $0xb0] sm:$0xff] }
  0xcc   : > { %891 = vrot.lane.b32.xlu1 %v418_v54, %s1788_s10  ;;  %889 = vrot.lane.b32.xlu0 %v417_v55, %s1788_s10 }
  0xce   : > { %v2127_v62 = vpop.permute.xlu1 %651  ;;  %v2129_v63 = vpop.permute.xlu0 %649 }
  0xcf   : > { %3051 = vst [vmem:[#allocation11_spill] sm:$0xff] %v2127_v62  ;;  %3052 = vst [vmem:[#allocation12_spill] sm:$0xff] %v2129_v63  ;;  %v477_v62 = vld [vmem:[%s2279_s13 + $0xa0] sm:$0xff] }
  0xd0   : > { %895 = vrot.lane.b32.xlu1 %v420_v58, %s1788_s10  ;;  %893 = vrot.lane.b32.xlu0 %v419_v59, %s1788_s10  ;;  %v436_v58 = vld [vmem:[%s2017_s9 + $0x158] sm:$0xff]  ;;  %v435_v59 = vld [vmem:[%s2017_s9 + $0x150] sm:$0xff] }
  0xd2   : > { %v2135_v6 = vpop.permute.xlu1 %655  ;;  %v2137_v7 = vpop.permute.xlu0 %653 }
  0xd3   : > { %3053 = vst [vmem:[#allocation13_spill] sm:$0xff] %v2135_v6  ;;  %3054 = vst [vmem:[#allocation14_spill] sm:$0xff] %v2137_v7  ;;  %v475_v6 = vld [vmem:[%s2279_s13 + $0x90] sm:$0xff] }
  0xd4   : > { %899 = vrot.lane.b32.xlu1 %v422_v2, %s1788_s10  ;;  %897 = vrot.lane.b32.xlu0 %v421_v3, %s1788_s10 }
  0xd6   : > { %v2143_v14 = vpop.permute.xlu1 %659  ;;  %v2145_v15 = vpop.permute.xlu0 %657 }
  0xd7   : > { %3055 = vst [vmem:[#allocation15_spill] sm:$0xff] %v2143_v14  ;;  %3056 = vst [vmem:[#allocation16_spill] sm:$0xff] %v2145_v15  ;;  %v473_v14 = vld [vmem:[%s2279_s13 + $0x80] sm:$0xff] }
  0xd8   : > { %903 = vrot.lane.b32.xlu1 %v424_v10, %s1788_s10  ;;  %901 = vrot.lane.b32.xlu0 %v423_v11, %s1788_s10  ;;  %v438_v10 = vld [vmem:[%s2017_s9 + $0x168] sm:$0xff]  ;;  %v437_v11 = vld [vmem:[%s2017_s9 + $0x160] sm:$0xff] }
  0xda   : > { %v2151_v22 = vpop.permute.xlu1 %663  ;;  %v2153_v23 = vpop.permute.xlu0 %661 }
  0xdb   : > { %3057 = vst [vmem:[#allocation17_spill] sm:$0xff] %v2151_v22  ;;  %3058 = vst [vmem:[#allocation18_spill] sm:$0xff] %v2153_v23  ;;  %v471_v22 = vld [vmem:[%s2279_s13 + $0x70] sm:$0xff] }
  0xdc   : > { %907 = vrot.lane.b32.xlu1 %v426_v18, %s1788_s10  ;;  %905 = vrot.lane.b32.xlu0 %v425_v19, %s1788_s10 }
  0xde   : > { %v2159_v30 = vpop.permute.xlu1 %667  ;;  %v2161_v31 = vpop.permute.xlu0 %665 }
  0xdf   : > { %3059 = vst [vmem:[#allocation19_spill] sm:$0xff] %v2159_v30  ;;  %3060 = vst [vmem:[#allocation20_spill] sm:$0xff] %v2161_v31  ;;  %v469_v30 = vld [vmem:[%s2279_s13 + $0x60] sm:$0xff] }
  0xe0   : > { %911 = vrot.lane.b32.xlu1 %v428_v26, %s1788_s10  ;;  %909 = vrot.lane.b32.xlu0 %v427_v27, %s1788_s10  ;;  %v440_v26 = vld [vmem:[%s2017_s9 + $0x178] sm:$0xff]  ;;  %v439_v27 = vld [vmem:[%s2017_s9 + $0x170] sm:$0xff] }
  0xe2   : > { %v2167_v38 = vpop.permute.xlu1 %671  ;;  %v2169_v39 = vpop.permute.xlu0 %669 }
  0xe3   : > { %3061 = vst [vmem:[#allocation21_spill] sm:$0xff] %v2167_v38  ;;  %3062 = vst [vmem:[#allocation22_spill] sm:$0xff] %v2169_v39  ;;  %v467_v38 = vld [vmem:[%s2279_s13 + $0x50] sm:$0xff] }
  0xe4   : > { %915 = vrot.lane.b32.xlu1 %v430_v34, %s1788_s10  ;;  %913 = vrot.lane.b32.xlu0 %v429_v35, %s1788_s10 }
  0xe6   : > { %v2175_v46 = vpop.permute.xlu1 %675  ;;  %v2177_v47 = vpop.permute.xlu0 %673 }
  0xe7   : > { %3063 = vst [vmem:[#allocation23_spill] sm:$0xff] %v2175_v46  ;;  %3064 = vst [vmem:[#allocation24_spill] sm:$0xff] %v2177_v47  ;;  %v465_v46 = vld [vmem:[%s2279_s13 + $0x40] sm:$0xff] }
  0xe8   : > { %919 = vrot.lane.b32.xlu1 %v432_v42, %s1788_s10  ;;  %917 = vrot.lane.b32.xlu0 %v431_v43, %s1788_s10  ;;  %v442_v42 = vld [vmem:[%s2017_s9 + $0x188] sm:$0xff]  ;;  %v441_v43 = vld [vmem:[%s2017_s9 + $0x180] sm:$0xff] }
  0xea   : > { %v2183_v54 = vpop.permute.xlu1 %679  ;;  %v2185_v55 = vpop.permute.xlu0 %677 }
  0xeb   : > { %3065 = vst [vmem:[#allocation25_spill] sm:$0xff] %v2183_v54  ;;  %3066 = vst [vmem:[#allocation26_spill] sm:$0xff] %v2185_v55  ;;  %v463_v54 = vld [vmem:[%s2279_s13 + $0x30] sm:$0xff] }
  0xec   : > { %923 = vrot.lane.b32.xlu1 %v434_v50, %s1788_s10  ;;  %921 = vrot.lane.b32.xlu0 %v433_v51, %s1788_s10 }
  0xee   : > { %v2191_v2 = vpop.permute.xlu1 %683  ;;  %v2193_v3 = vpop.permute.xlu0 %681 }
  0xef   : > { %3067 = vst [vmem:[#allocation27_spill] sm:$0xff] %v2191_v2  ;;  %3068 = vst [vmem:[#allocation28_spill] sm:$0xff] %v2193_v3  ;;  %v461_v2 = vld [vmem:[%s2279_s13 + $0x20] sm:$0xff] }
  0xf0   : > { %927 = vrot.lane.b32.xlu1 %v436_v58, %s1788_s10  ;;  %925 = vrot.lane.b32.xlu0 %v435_v59, %s1788_s10  ;;  %v444_v58 = vld [vmem:[%s2017_s9 + $0x198] sm:$0xff]  ;;  %v443_v59 = vld [vmem:[%s2017_s9 + $0x190] sm:$0xff] }
  0xf2   : > { %v2199_v18 = vpop.permute.xlu1 %687  ;;  %v2201_v19 = vpop.permute.xlu0 %685 }
  0xf3   : > { %3069 = vst [vmem:[#allocation29_spill] sm:$0xff] %v2199_v18  ;;  %3070 = vst [vmem:[#allocation30_spill] sm:$0xff] %v2201_v19  ;;  %v460_v19 = vld [vmem:[%s2279_s13 + $0x18] sm:$0xff]  ;;  %v459_v18 = vld [vmem:[%s2279_s13 + $0x10] sm:$0xff] }
  0xf4   : > { %931 = vrot.lane.b32.xlu1 %v438_v10, %s1788_s10  ;;  %929 = vrot.lane.b32.xlu0 %v437_v11, %s1788_s10 }
  0xf6   : > { %v2207_v34 = vpop.permute.xlu1 %691  ;;  %v2209_v35 = vpop.permute.xlu0 %689 }
  0xf7   : > { %3071 = vst [vmem:[#allocation31_spill] sm:$0xff] %v2207_v34  ;;  %3072 = vst [vmem:[#allocation32_spill] sm:$0xff] %v2209_v35 }
  0xf8   : > { %935 = vrot.lane.b32.xlu1 %v440_v26, %s1788_s10  ;;  %933 = vrot.lane.b32.xlu0 %v439_v27, %s1788_s10  ;;  %v446_v26 = vld [vmem:[%s2017_s9 + $0x1a8] sm:$0xff]  ;;  %v445_v27 = vld [vmem:[%s2017_s9 + $0x1a0] sm:$0xff] }
  0xfa   : > { %v2215_v50 = vpop.permute.xlu1 %695  ;;  %v2217_v51 = vpop.permute.xlu0 %693 }
  0xfb   : > { %3073 = vst [vmem:[#allocation33_spill] sm:$0xff] %v2215_v50  ;;  %3074 = vst [vmem:[#allocation34_spill] sm:$0xff] %v2217_v51 }
  0xfc   : > { %939 = vrot.lane.b32.xlu1 %v442_v42, %s1788_s10  ;;  %937 = vrot.lane.b32.xlu0 %v441_v43, %s1788_s10  ;;  %v448_v43 = vld [vmem:[%s2017_s9 + $0x1b8] sm:$0xff] }
  0xfe   : > { %v2223_v10 = vpop.permute.xlu1 %699  ;;  %v2225_v11 = vpop.permute.xlu0 %697 }
  0xff   : > { %3075 = vst [vmem:[#allocation35_spill] sm:$0xff] %v2223_v10  ;;  %3076 = vst [vmem:[#allocation36_spill] sm:$0xff] %v2225_v11  ;;  %v447_v10 = vld [vmem:[%s2017_s9 + $0x1b0] sm:$0xff] }
 0x100   : > { %943 = vrot.lane.b32.xlu1 %v444_v58, %s1788_s10  ;;  %941 = vrot.lane.b32.xlu0 %v443_v59, %s1788_s10  ;;  %v450_v59 = vld [vmem:[%s2017_s9 + $0x1c8] sm:$0xff] }
 0x102   : > { %v2231_v51 = vpop.permute.xlu1 %703  ;;  %v2233_v42 = vpop.permute.xlu0 %701 }
 0x103   : > { %3077 = vst [vmem:[#allocation37_spill] sm:$0xff] %v2231_v51  ;;  %3078 = vst [vmem:[#allocation38_spill] sm:$0xff] %v2233_v42  ;;  %v449_v51 = vld [vmem:[%s2017_s9 + $0x1c0] sm:$0xff] }
 0x104   : > { %947 = vrot.lane.b32.xlu1 %v446_v26, %s1788_s10  ;;  %945 = vrot.lane.b32.xlu0 %v445_v27, %s1788_s10  ;;  %v452_v27 = vld [vmem:[%s2017_s9 + $0x1d8] sm:$0xff] }
 0x106   : > { %v2239_v11 = vpop.permute.xlu1 %707  ;;  %v2241_v58 = vpop.permute.xlu0 %705 }
 0x107   : > { %3079 = vst [vmem:[#allocation39_spill] sm:$0xff] %v2239_v11  ;;  %3080 = vst [vmem:[#allocation40_spill] sm:$0xff] %v2241_v58  ;;  %v451_v58 = vld [vmem:[%s2017_s9 + $0x1d0] sm:$0xff] }
 0x108   : > { %951 = vrot.lane.b32.xlu1 %v448_v43, %s1788_s10  ;;  %949 = vrot.lane.b32.xlu0 %v447_v10, %s1788_s10  ;;  %v454_v10 = vld [vmem:[%s2017_s9 + $0x1e8] sm:$0xff] }
 0x10a   : > { %v2247_v42 = vpop.permute.xlu1 %711  ;;  %v2249_v26 = vpop.permute.xlu0 %709 }
 0x10b   : > { %3081 = vst [vmem:[#allocation41_spill] sm:$0xff] %v2247_v42  ;;  %3082 = vst [vmem:[#allocation42_spill] sm:$0xff] %v2249_v26  ;;  %v453_v42 = vld [vmem:[%s2017_s9 + $0x1e0] sm:$0xff] }
 0x10c   : > { %955 = vrot.lane.b32.xlu1 %v450_v59, %s1788_s10  ;;  %953 = vrot.lane.b32.xlu0 %v449_v51, %s1788_s10  ;;  %v456_v51 = vld [vmem:[%s2017_s9 + $0x1f8] sm:$0xff]  ;;  %v455_v59 = vld [vmem:[%s2017_s9 + $0x1f0] sm:$0xff]  ;;  %s1723_s9 = scalar_lea.vmem %s2985_s5, 8192 }
 0x10d   : > { %p1724_p11 = scmp.ne.s32.totalorder %s2985_s5, %s1723_s9 }
 0x10e   : > { %v2255_v11 = vpop.permute.xlu1 %843  ;;  %v2257_v43 = vpop.permute.xlu0 %841 }
 0x10f   : > { %p1725_p12 = pnand %p1724_p11, %p1856_p5 }
 0x110   : > { %959 = vrot.lane.b32.xlu1 %v452_v27, %s1788_s10  ;;  %957 = vrot.lane.b32.xlu0 %v451_v58, %s1788_s10  ;;  %v457_v58 = vld [vmem:[%s2279_s13] sm:$0xff] }
 0x111   : > { %p1726_p13 = pneg %p1725_p12 }
 0x112   : > { %v2263_v50 = vpop.permute.xlu1 %847  ;;  %v2265_v26 = vpop.permute.xlu0 %845 }
 0x114   : > { %963 = vrot.lane.b32.xlu1 %v454_v10, %s1788_s10  ;;  %961 = vrot.lane.b32.xlu0 %v453_v42, %s1788_s10  ;;  %v458_v42 = vld [vmem:[%s2279_s13 + $0x8] sm:$0xff] }
 0x116   : > { %v2271_v35 = vpop.permute.xlu1 %851  ;;  %v2273_v34 = vpop.permute.xlu0 %849 }
 0x118   : > { %967 = vrot.lane.b32.xlu1 %v456_v51, %s1788_s10  ;;  %965 = vrot.lane.b32.xlu0 %v455_v59, %s1788_s10  ;;  %v462_v59 = vld [vmem:[%s2279_s13 + $0x28] sm:$0xff]  ;;  %s1790_s10 = smov [#allocation2]  }
 0x119   : > { %s1727_s11 = sshll.u32 %s1790_s10, 4  ;;  %s1728_s11 = int_to_ptr.vmem [resolvable:$false] %s1727_s11 }
 0x11a   : > { %v2285_v27 = vpop.permute.xlu1 %855  ;;  %v2287_v10 = vpop.permute.xlu0 %853  ;;  %s1729_s12 = scalar_lea.vmem %s1728_s11, 16384  ;;  %p1730_p0 = scmp.lt.s32.totalorder %s2985_s5, %s1728_s11 }
 0x11b   : > { %p1731_p1 = scmp.lt.s32.totalorder %s1729_s12, %s1723_s9 }
 0x11c   : > { %1099 = vrot.lane.b32.xlu1 %v458_v42, %s1789_s14  ;;  %1097 = vrot.lane.b32.xlu0 %v457_v58, %s1789_s14  ;;  %v464_v58 = vld [vmem:[%s2279_s13 + $0x38] sm:$0xff] }
 0x11d   : > { %p1732_p2 = por %p1731_p1, %p1730_p0 }
 0x11e   : > { %v2293_v3 = vpop.permute.xlu1 %859  ;;  %v2295_v51 = vpop.permute.xlu0 %857 }
 0x11f   : > { %p1733_p3 = pnand %p1732_p2, %p1726_p13 }
 0x120   : > { %1103 = vrot.lane.b32.xlu1 %v460_v19, %s1789_s14  ;;  %1101 = vrot.lane.b32.xlu0 %v459_v18, %s1789_s14  ;;  %v466_v18 = vld [vmem:[%s2279_s13 + $0x48] sm:$0xff] }
 0x122   : > { %v2301_v55 = vpop.permute.xlu1 %863  ;;  %v2303_v42 = vpop.permute.xlu0 %861 }
 0x124   : > { %1107 = vrot.lane.b32.xlu1 %v462_v59, %s1789_s14  ;;  %1105 = vrot.lane.b32.xlu0 %v461_v2, %s1789_s14  ;;  %v468_v2 = vld [vmem:[%s2279_s13 + $0x58] sm:$0xff] }
 0x126   : > { %v2309_v47 = vpop.permute.xlu1 %867  ;;  %v2311_v19 = vpop.permute.xlu0 %865 }
 0x128   : > { %1111 = vrot.lane.b32.xlu1 %v464_v58, %s1789_s14  ;;  %1109 = vrot.lane.b32.xlu0 %v463_v54, %s1789_s14  ;;  %v470_v54 = vld [vmem:[%s2279_s13 + $0x68] sm:$0xff] }
 0x12a   : > { %v2317_v39 = vpop.permute.xlu1 %871  ;;  %v2319_v59 = vpop.permute.xlu0 %869 }
 0x12c   : > { %1115 = vrot.lane.b32.xlu1 %v466_v18, %s1789_s14  ;;  %1113 = vrot.lane.b32.xlu0 %v465_v46, %s1789_s14  ;;  %v472_v46 = vld [vmem:[%s2279_s13 + $0x78] sm:$0xff] }
 0x12e   : > { %v2325_v31 = vpop.permute.xlu1 %875  ;;  %v2327_v58 = vpop.permute.xlu0 %873 }
 0x130   : > { %1119 = vrot.lane.b32.xlu1 %v468_v2, %s1789_s14  ;;  %1117 = vrot.lane.b32.xlu0 %v467_v38, %s1789_s14  ;;  %v474_v38 = vld [vmem:[%s2279_s13 + $0x88] sm:$0xff] }
 0x132   : > { %v2333_v23 = vpop.permute.xlu1 %879  ;;  %v2335_v18 = vpop.permute.xlu0 %877 }
 0x134   : > { %1123 = vrot.lane.b32.xlu1 %v470_v54, %s1789_s14  ;;  %1121 = vrot.lane.b32.xlu0 %v469_v30, %s1789_s14  ;;  %v476_v30 = vld [vmem:[%s2279_s13 + $0x98] sm:$0xff] }
 0x136   : > { %v2341_v15 = vpop.permute.xlu1 %883  ;;  %v2343_v2 = vpop.permute.xlu0 %881 }
 0x138   : > { %1127 = vrot.lane.b32.xlu1 %v472_v46, %s1789_s14  ;;  %1125 = vrot.lane.b32.xlu0 %v471_v22, %s1789_s14  ;;  %v478_v22 = vld [vmem:[%s2279_s13 + $0xa8] sm:$0xff] }
 0x13a   : > { %v2349_v7 = vpop.permute.xlu1 %887  ;;  %v2351_v54 = vpop.permute.xlu0 %885 }
 0x13c   : > { %1131 = vrot.lane.b32.xlu1 %v474_v38, %s1789_s14  ;;  %1129 = vrot.lane.b32.xlu0 %v473_v14, %s1789_s14  ;;  %v480_v14 = vld [vmem:[%s2279_s13 + $0xb8] sm:$0xff] }
 0x13e   : > { %v2357_v63 = vpop.permute.xlu1 %891  ;;  %v2359_v46 = vpop.permute.xlu0 %889 }
 0x140   : > { %1135 = vrot.lane.b32.xlu1 %v476_v30, %s1789_s14  ;;  %1133 = vrot.lane.b32.xlu0 %v475_v6, %s1789_s14  ;;  %v482_v6 = vld [vmem:[%s2279_s13 + $0xc8] sm:$0xff] }
 0x142   : > { %v2365_v57 = vpop.permute.xlu1 %895  ;;  %v2367_v38 = vpop.permute.xlu0 %893 }
 0x143   : > { %3083 = vst [vmem:[#allocation43_spill] sm:$0xff] %v2365_v57  ;;  %3084 = vst [vmem:[#allocation44_spill] sm:$0xff] %v2367_v38  ;;  %v515_v57 = vld [vmem:[%s2279_s13 + $0x1d0] sm:$0xff] }
 0x144   : > { %1139 = vrot.lane.b32.xlu1 %v478_v22, %s1789_s14  ;;  %1137 = vrot.lane.b32.xlu0 %v477_v62, %s1789_s14  ;;  %v484_v62 = vld [vmem:[%s2279_s13 + $0xd8] sm:$0xff] }
 0x146   : > { %v2373_v53 = vpop.permute.xlu1 %899  ;;  %v2375_v30 = vpop.permute.xlu0 %897 }
 0x147   : > { %3085 = vst [vmem:[#allocation45_spill] sm:$0xff] %v2373_v53  ;;  %3086 = vst [vmem:[#allocation46_spill] sm:$0xff] %v2375_v30  ;;  %v483_v53 = vld [vmem:[%s2279_s13 + $0xd0] sm:$0xff] }
 0x148   : > { %1143 = vrot.lane.b32.xlu1 %v480_v14, %s1789_s14  ;;  %1141 = vrot.lane.b32.xlu0 %v479_v56, %s1789_s14  ;;  %v486_v56 = vld [vmem:[%s2279_s13 + $0xe8] sm:$0xff] }
 0x14a   : > { %v2381_v38 = vpop.permute.xlu1 %903  ;;  %v2383_v22 = vpop.permute.xlu0 %901 }
 0x14b   : > { %3087 = vst [vmem:[#allocation47_spill] sm:$0xff] %v2381_v38  ;;  %3088 = vst [vmem:[#allocation48_spill] sm:$0xff] %v2383_v22  ;;  %v485_v38 = vld [vmem:[%s2279_s13 + $0xe0] sm:$0xff] }
 0x14c   : > { %1147 = vrot.lane.b32.xlu1 %v482_v6, %s1789_s14  ;;  %1145 = vrot.lane.b32.xlu0 %v481_v52, %s1789_s14  ;;  %v488_v52 = vld [vmem:[%s2279_s13 + $0xf8] sm:$0xff] }
 0x14e   : > { %v2389_v30 = vpop.permute.xlu1 %907  ;;  %v2391_v14 = vpop.permute.xlu0 %905 }
 0x14f   : > { %3089 = vst [vmem:[#allocation49_spill] sm:$0xff] %v2389_v30  ;;  %3090 = vst [vmem:[#allocation50_spill] sm:$0xff] %v2391_v14  ;;  %v487_v30 = vld [vmem:[%s2279_s13 + $0xf0] sm:$0xff] }
 0x150   : > { %1151 = vrot.lane.b32.xlu1 %v484_v62, %s1789_s14  ;;  %1149 = vrot.lane.b32.xlu0 %v483_v53, %s1789_s14  ;;  %v490_v53 = vld [vmem:[%s2279_s13 + $0x108] sm:$0xff] }
 0x152   : > { %v2397_v22 = vpop.permute.xlu1 %911  ;;  %v2399_v6 = vpop.permute.xlu0 %909 }
 0x153   : > { %3091 = vst [vmem:[#allocation51_spill] sm:$0xff] %v2397_v22  ;;  %3092 = vst [vmem:[#allocation52_spill] sm:$0xff] %v2399_v6  ;;  %v489_v22 = vld [vmem:[%s2279_s13 + $0x100] sm:$0xff] }
 0x154   : > { %1155 = vrot.lane.b32.xlu1 %v486_v56, %s1789_s14  ;;  %1153 = vrot.lane.b32.xlu0 %v485_v38, %s1789_s14  ;;  %v492_v38 = vld [vmem:[%s2279_s13 + $0x118] sm:$0xff] }
 0x156   : > { %v2405_v14 = vpop.permute.xlu1 %915  ;;  %v2407_v62 = vpop.permute.xlu0 %913 }
 0x157   : > { %3093 = vst [vmem:[#allocation53_spill] sm:$0xff] %v2405_v14  ;;  %3094 = vst [vmem:[#allocation54_spill] sm:$0xff] %v2407_v62  ;;  %v491_v14 = vld [vmem:[%s2279_s13 + $0x110] sm:$0xff] }
 0x158   : > { %1159 = vrot.lane.b32.xlu1 %v488_v52, %s1789_s14  ;;  %1157 = vrot.lane.b32.xlu0 %v487_v30, %s1789_s14  ;;  %v494_v30 = vld [vmem:[%s2279_s13 + $0x128] sm:$0xff] }
 0x15a   : > { %v2413_v6 = vpop.permute.xlu1 %919  ;;  %v2415_v56 = vpop.permute.xlu0 %917 }
 0x15b   : > { %3095 = vst [vmem:[#allocation55_spill] sm:$0xff] %v2413_v6  ;;  %3096 = vst [vmem:[#allocation56_spill] sm:$0xff] %v2415_v56  ;;  %v493_v6 = vld [vmem:[%s2279_s13 + $0x120] sm:$0xff] }
 0x15c   : > { %1163 = vrot.lane.b32.xlu1 %v490_v53, %s1789_s14  ;;  %1161 = vrot.lane.b32.xlu0 %v489_v22, %s1789_s14  ;;  %v496_v22 = vld [vmem:[%s2279_s13 + $0x138] sm:$0xff] }
 0x15e   : > { %v2421_v62 = vpop.permute.xlu1 %923  ;;  %v2423_v52 = vpop.permute.xlu0 %921 }
 0x15f   : > { %3097 = vst [vmem:[#allocation57_spill] sm:$0xff] %v2421_v62  ;;  %3098 = vst [vmem:[#allocation58_spill] sm:$0xff] %v2423_v52  ;;  %v495_v62 = vld [vmem:[%s2279_s13 + $0x130] sm:$0xff] }
 0x160   : > { %1167 = vrot.lane.b32.xlu1 %v492_v38, %s1789_s14  ;;  %1165 = vrot.lane.b32.xlu0 %v491_v14, %s1789_s14  ;;  %v498_v14 = vld [vmem:[%s2279_s13 + $0x148] sm:$0xff] }
 0x162   : > { %v2429_v56 = vpop.permute.xlu1 %927  ;;  %v2431_v53 = vpop.permute.xlu0 %925 }
 0x163   : > { %3099 = vst [vmem:[#allocation59_spill] sm:$0xff] %v2429_v56  ;;  %3100 = vst [vmem:[#allocation60_spill] sm:$0xff] %v2431_v53  ;;  %v497_v56 = vld [vmem:[%s2279_s13 + $0x140] sm:$0xff] }
 0x164   : > { %1171 = vrot.lane.b32.xlu1 %v494_v30, %s1789_s14  ;;  %1169 = vrot.lane.b32.xlu0 %v493_v6, %s1789_s14  ;;  %v500_v6 = vld [vmem:[%s2279_s13 + $0x158] sm:$0xff] }
 0x166   : > { %v2437_v52 = vpop.permute.xlu1 %931  ;;  %v2439_v38 = vpop.permute.xlu0 %929 }
 0x167   : > { %3101 = vst [vmem:[#allocation61_spill] sm:$0xff] %v2437_v52  ;;  %3102 = vst [vmem:[#allocation62_spill] sm:$0xff] %v2439_v38  ;;  %v499_v52 = vld [vmem:[%s2279_s13 + $0x150] sm:$0xff] }
 0x168   : > { %1175 = vrot.lane.b32.xlu1 %v496_v22, %s1789_s14  ;;  %1173 = vrot.lane.b32.xlu0 %v495_v62, %s1789_s14  ;;  %v502_v62 = vld [vmem:[%s2279_s13 + $0x168] sm:$0xff] }
 0x16a   : > { %v2445_v53 = vpop.permute.xlu1 %935  ;;  %v2447_v30 = vpop.permute.xlu0 %933 }
 0x16b   : > { %3103 = vst [vmem:[#allocation63_spill] sm:$0xff] %v2445_v53  ;;  %3104 = vst [vmem:[#allocation64_spill] sm:$0xff] %v2447_v30  ;;  %v501_v53 = vld [vmem:[%s2279_s13 + $0x160] sm:$0xff] }
 0x16c   : > { %1179 = vrot.lane.b32.xlu1 %v498_v14, %s1789_s14  ;;  %1177 = vrot.lane.b32.xlu0 %v497_v56, %s1789_s14  ;;  %v504_v56 = vld [vmem:[%s2279_s13 + $0x178] sm:$0xff] }
 0x16e   : > { %v2453_v38 = vpop.permute.xlu1 %939  ;;  %v2455_v22 = vpop.permute.xlu0 %937 }
 0x16f   : > { %3105 = vst [vmem:[#allocation65_spill] sm:$0xff] %v2453_v38  ;;  %3106 = vst [vmem:[#allocation66_spill] sm:$0xff] %v2455_v22  ;;  %v503_v38 = vld [vmem:[%s2279_s13 + $0x170] sm:$0xff] }
 0x170   : > { %1183 = vrot.lane.b32.xlu1 %v500_v6, %s1789_s14  ;;  %1181 = vrot.lane.b32.xlu0 %v499_v52, %s1789_s14  ;;  %v506_v52 = vld [vmem:[%s2279_s13 + $0x188] sm:$0xff] }
 0x172   : > { %v2461_v30 = vpop.permute.xlu1 %943  ;;  %v2463_v14 = vpop.permute.xlu0 %941 }
 0x173   : > { %3107 = vst [vmem:[#allocation67_spill] sm:$0xff] %v2461_v30  ;;  %3108 = vst [vmem:[#allocation68_spill] sm:$0xff] %v2463_v14  ;;  %v505_v30 = vld [vmem:[%s2279_s13 + $0x180] sm:$0xff] }
 0x174   : > { %1187 = vrot.lane.b32.xlu1 %v502_v62, %s1789_s14  ;;  %1185 = vrot.lane.b32.xlu0 %v501_v53, %s1789_s14  ;;  %v508_v53 = vld [vmem:[%s2279_s13 + $0x198] sm:$0xff] }
 0x176   : > { %v2469_v22 = vpop.permute.xlu1 %947  ;;  %v2471_v6 = vpop.permute.xlu0 %945 }
 0x177   : > { %3109 = vst [vmem:[#allocation69_spill] sm:$0xff] %v2469_v22  ;;  %3110 = vst [vmem:[#allocation70_spill] sm:$0xff] %v2471_v6  ;;  %v507_v6 = vld [vmem:[%s2279_s13 + $0x190] sm:$0xff] }
 0x178   : > { %1191 = vrot.lane.b32.xlu1 %v504_v56, %s1789_s14  ;;  %1189 = vrot.lane.b32.xlu0 %v503_v38, %s1789_s14  ;;  %v510_v38 = vld [vmem:[%s2279_s13 + $0x1a8] sm:$0xff] }
 0x17a   : > { %v2477_v14 = vpop.permute.xlu1 %951  ;;  %v2479_v62 = vpop.permute.xlu0 %949 }
 0x17b   : > { %3111 = vst [vmem:[#allocation71_spill] sm:$0xff] %v2477_v14  ;;  %3112 = vst [vmem:[#allocation72_spill] sm:$0xff] %v2479_v62  ;;  %v509_v62 = vld [vmem:[%s2279_s13 + $0x1a0] sm:$0xff] }
 0x17c   : > { %1195 = vrot.lane.b32.xlu1 %v506_v52, %s1789_s14  ;;  %1193 = vrot.lane.b32.xlu0 %v505_v30, %s1789_s14  ;;  %v512_v30 = vld [vmem:[%s2279_s13 + $0x1b8] sm:$0xff] }
 0x17e   : > { %v2485_v22 = vpop.permute.xlu1 %955  ;;  %v2487_v56 = vpop.permute.xlu0 %953 }
 0x17f   : > { %3113 = vst [vmem:[#allocation73_spill] sm:$0xff] %v2485_v22  ;;  %3114 = vst [vmem:[#allocation74_spill] sm:$0xff] %v2487_v56  ;;  %v511_v22 = vld [vmem:[%s2279_s13 + $0x1b0] sm:$0xff] }
 0x180   : > { %1199 = vrot.lane.b32.xlu1 %v508_v53, %s1789_s14  ;;  %1197 = vrot.lane.b32.xlu0 %v507_v6, %s1789_s14  ;;  %v514_v6 = vld [vmem:[%s2279_s13 + $0x1c8] sm:$0xff] }
 0x182   : > { %v2493_v14 = vpop.permute.xlu1 %959  ;;  %v2495_v52 = vpop.permute.xlu0 %957 }
 0x183   : > { %3115 = vst [vmem:[#allocation75_spill] sm:$0xff] %v2493_v14  ;;  %3116 = vst [vmem:[#allocation76_spill] sm:$0xff] %v2495_v52  ;;  %v516_v14 = vld [vmem:[%s2279_s13 + $0x1d8] sm:$0xff] }
 0x184   : > { %1203 = vrot.lane.b32.xlu1 %v510_v38, %s1789_s14  ;;  %1201 = vrot.lane.b32.xlu0 %v509_v62, %s1789_s14  ;;  %v513_v62 = vld [vmem:[%s2279_s13 + $0x1c0] sm:$0xff] }
 0x185   : > { %v265_v38 = vld [vmem:[%s2509_s23] sm:$0xff] }
 0x186   : > { %v2501_v56 = vpop.permute.xlu1 %963  ;;  %v2503_v53 = vpop.permute.xlu0 %961 }
 0x187   : > { %3117 = vst [vmem:[#allocation77_spill] sm:$0xff] %v2501_v56  ;;  %3118 = vst [vmem:[#allocation78_spill] sm:$0xff] %v2503_v53  ;;  %v266_v53 = vld [vmem:[%s2509_s23 + $0x8] sm:$0xff] }
 0x188   : > { %1207 = vrot.lane.b32.xlu1 %v512_v30, %s1789_s14  ;;  %1205 = vrot.lane.b32.xlu0 %v511_v22, %s1789_s14  ;;  %v1290_v22 = vsel %vm1289_vm0, %v265_v38, %v1995_v61  ;;  %v1291_v30 = vsel %vm1289_vm0, %v266_v53, %v2003_v1  ;;  %v270_v53 = vld [vmem:[%s2509_s23 + $0x28] sm:$0xff]  ;;  %v269_v38 = vld [vmem:[%s2509_s23 + $0x20] sm:$0xff] }
 0x189   : > { %v1356_v49 = vsel %vm1354_vm1, %v1291_v30, %v2255_v11 }
 0x18a   : > { %v2518_v56 = vpop.permute.xlu1 %967  ;;  %v2520_v52 = vpop.permute.xlu0 %965 }
 0x18b   : > { %3119 = vst [vmem:[#allocation79_spill] sm:$0xff] %v2518_v56  ;;  %3120 = vst [vmem:[#allocation80_spill] sm:$0xff] %v2520_v52  ;;  %v267_v56 = vld [vmem:[%s2509_s23 + $0x10] sm:$0xff]  ;;  %v268_v52 = vld [vmem:[%s2509_s23 + $0x18] sm:$0xff] }
 0x18c   : > { %1211 = vrot.lane.b32.xlu1 %v514_v6, %s1789_s14  ;;  %1209 = vrot.lane.b32.xlu0 %v513_v62, %s1789_s14  ;;  %v1355_v6 = vsel %vm1354_vm1, %v1290_v22, %v2257_v43  ;;  %v1292_v11 = vsel %vm1289_vm0, %v267_v56, %v1993_v60  ;;  %v518_v43 = vld [vmem:[%s2279_s13 + $0x1e8] sm:$0xff]  ;;  %v520_v56 = vld [vmem:[%s2279_s13 + $0x1f8] sm:$0xff] }
 0x18e   : > { %v1100_v62 = vpop.permute.xlu1 %1099  ;;  %v1098_v48 = vpop.permute.xlu0 %1097 }
 0x18f   : > { %v1421_v61 = vsel %vm1419_vm2, %v1356_v49, %v1100_v62  ;;  %v1420_v1 = vsel %vm1419_vm2, %v1355_v6, %v1098_v48  ;;  %v1293_v49 = vsel %vm1289_vm0, %v268_v52, %v2001_v0  ;;  %v517_v48 = vld [vmem:[%s2279_s13 + $0x1e0] sm:$0xff]  ;;  %v519_v52 = vld [vmem:[%s2279_s13 + $0x1f0] sm:$0xff]  ;;  %v272_v6 = vld [vmem:[%s2509_s23 + $0x38] sm:$0xff] }
 0x190   : > { %1485 = vst [vmem:[%s2540_s29 + $0x8] sm:$0xff] %v1421_v61  ;;  %1484 = vst [vmem:[%s2540_s29] sm:$0xff] %v1420_v1  ;;  %1215 = vrot.lane.b32.xlu1 %v516_v14, %s1789_s14  ;;  %1213 = vrot.lane.b32.xlu0 %v515_v57, %s1789_s14  ;;  %v1358_v22 = vsel %vm1354_vm1, %v1293_v49, %v2263_v50  ;;  %v1357_v57 = vsel %vm1354_vm1, %v1292_v11, %v2265_v26 }
 0x191   : > { %v1295_v50 = vsel %vm1289_vm0, %v270_v53, %v2009_v4  ;;  %v1294_v26 = vsel %vm1289_vm0, %v269_v38, %v2011_v5  ;;  %v271_v62 = vld [vmem:[%s2509_s23 + $0x30] sm:$0xff]  ;;  %v1297_v5 = vsel %vm1289_vm0, %v272_v6, %v2023_v8 }
 0x192   : > { %v1104_v14 = vpop.permute.xlu1 %1103  ;;  %v1102_v30 = vpop.permute.xlu0 %1101  ;;  %v1360_v61 = vsel %vm1354_vm1, %v1295_v50, %v2271_v35  ;;  %v1359_v1 = vsel %vm1354_vm1, %v1294_v26, %v2273_v34  ;;  %v1296_v34 = vsel %vm1289_vm0, %v271_v62, %v2025_v9  ;;  %v274_v35 = vld [vmem:[%s2509_s23 + $0x48] sm:$0xff]  ;;  %v1362_v53 = vsel %vm1354_vm1, %v1297_v5, %v2285_v27  ;;  %v276_v27 = vld [vmem:[%s2509_s23 + $0x58] sm:$0xff] }
 0x193   : > { %v1423_v60 = vsel %vm1419_vm2, %v1358_v22, %v1104_v14  ;;  %v1422_v0 = vsel %vm1419_vm2, %v1357_v57, %v1102_v30  ;;  %v1361_v38 = vsel %vm1354_vm1, %v1296_v34, %v2287_v10  ;;  %v1299_v8 = vsel %vm1289_vm0, %v274_v35, %v2031_v12  ;;  %v275_v10 = vld [vmem:[%s2509_s23 + $0x50] sm:$0xff] }
 0x194   : > { %1487 = vst [vmem:[%s2540_s29 + $0x18] sm:$0xff] %v1423_v60  ;;  %1486 = vst [vmem:[%s2540_s29 + $0x10] sm:$0xff] %v1422_v0  ;;  %1219 = vrot.lane.b32.xlu1 %v518_v43, %s1789_s14  ;;  %1217 = vrot.lane.b32.xlu0 %v517_v48, %s1789_s14  ;;  %v1364_v60 = vsel %vm1354_vm1, %v1299_v8, %v2293_v3  ;;  %v1301_v12 = vsel %vm1289_vm0, %v276_v27, %v2039_v16 }
 0x195   : > { %v273_v48 = vld [vmem:[%s2509_s23 + $0x40] sm:$0xff]  ;;  %v278_v3 = vld [vmem:[%s2509_s23 + $0x68] sm:$0xff]  ;;  %v1366_v6 = vsel %vm1354_vm1, %v1301_v12, %v2301_v55  ;;  %v280_v55 = vld [vmem:[%s2509_s23 + $0x78] sm:$0xff] }
 0x196   : > { %v1108_v11 = vpop.permute.xlu1 %1107  ;;  %v1106_v49 = vpop.permute.xlu0 %1105  ;;  %v1298_v9 = vsel %vm1289_vm0, %v273_v48, %v2033_v13  ;;  %v1300_v13 = vsel %vm1289_vm0, %v275_v10, %v2041_v17  ;;  %v1303_v16 = vsel %vm1289_vm0, %v278_v3, %v2047_v20  ;;  %v1305_v20 = vsel %vm1289_vm0, %v280_v55, %v2055_v24 }
 0x197   : > { %v1425_v43 = vsel %vm1419_vm2, %v1360_v61, %v1108_v11  ;;  %v1424_v4 = vsel %vm1419_vm2, %v1359_v1, %v1106_v49  ;;  %v1363_v0 = vsel %vm1354_vm1, %v1298_v9, %v2295_v51  ;;  %v277_v51 = vld [vmem:[%s2509_s23 + $0x60] sm:$0xff]  ;;  %v1365_v62 = vsel %vm1354_vm1, %v1300_v13, %v2303_v42  ;;  %v279_v42 = vld [vmem:[%s2509_s23 + $0x70] sm:$0xff] }
 0x198   : > { %1489 = vst [vmem:[%s2540_s29 + $0x28] sm:$0xff] %v1425_v43  ;;  %1488 = vst [vmem:[%s2540_s29 + $0x20] sm:$0xff] %v1424_v4  ;;  %1223 = vrot.lane.b32.xlu1 %v520_v56, %s1789_s14  ;;  %1221 = vrot.lane.b32.xlu0 %v519_v52, %s1789_s14  ;;  %v1302_v17 = vsel %vm1289_vm0, %v277_v51, %v2049_v21  ;;  %v1368_v43 = vsel %vm1354_vm1, %v1303_v16, %v2309_v47 }
 0x199   : > { %v1367_v4 = vsel %vm1354_vm1, %v1302_v17, %v2311_v19  ;;  %v1304_v21 = vsel %vm1289_vm0, %v279_v42, %v2057_v25  ;;  %v282_v47 = vld [vmem:[%s2509_s23 + $0x88] sm:$0xff]  ;;  %v281_v19 = vld [vmem:[%s2509_s23 + $0x80] sm:$0xff] }
 0x19a   : > { %v1112_v22 = vpop.permute.xlu1 %1111  ;;  %v1110_v57 = vpop.permute.xlu0 %1109  ;;  %v1307_v24 = vsel %vm1289_vm0, %v282_v47, %v2063_v28  ;;  %v1306_v25 = vsel %vm1289_vm0, %v281_v19, %v2065_v29  ;;  %v3123_v47 = vld [vmem:[#allocation43_spill] sm:$0xff] }
 0x19b   : > { %v1427_v14 = vsel %vm1419_vm2, %v1362_v53, %v1112_v22  ;;  %v1426_v30 = vsel %vm1419_vm2, %v1361_v38, %v1110_v57  ;;  %v1370_v53 = vsel %vm1354_vm1, %v1305_v20, %v2317_v39  ;;  %v1369_v38 = vsel %vm1354_vm1, %v1304_v21, %v2319_v59  ;;  %v284_v39 = vld [vmem:[%s2509_s23 + $0x98] sm:$0xff]  ;;  %v283_v59 = vld [vmem:[%s2509_s23 + $0x90] sm:$0xff]  ;;  %v3122_v20 = vld [vmem:[#allocation6_spill] sm:$0xff] }
 0x19c   : > { %1491 = vst [vmem:[%s2540_s29 + $0x38] sm:$0xff] %v1427_v14  ;;  %1490 = vst [vmem:[%s2540_s29 + $0x30] sm:$0xff] %v1426_v30  ;;  %v1372_v8 = vsel %vm1354_vm1, %v1307_v24, %v2325_v31  ;;  %v1371_v9 = vsel %vm1354_vm1, %v1306_v25, %v2327_v58  ;;  %v1309_v28 = vsel %vm1289_vm0, %v284_v39, %v2071_v32  ;;  %v286_v31 = vld [vmem:[%s2509_s23 + $0xa8] sm:$0xff]  ;;  %v285_v58 = vld [vmem:[%s2509_s23 + $0xa0] sm:$0xff] }
 0x19d   : > { %v1308_v29 = vsel %vm1289_vm0, %v283_v59, %v2073_v33  ;;  %v1311_v32 = vsel %vm1289_vm0, %v286_v31, %v2079_v36  ;;  %v1310_v33 = vsel %vm1289_vm0, %v285_v58, %v2081_v37  ;;  %v294_v21 = vld [vmem:[%s2509_s23 + $0xe8] sm:$0xff]  ;;  %v3125_v24 = vld [vmem:[#allocation7_spill] sm:$0xff]  ;;  %v3126_v39 = vld [vmem:[#allocation8_spill] sm:$0xff] }
 0x19e   : > { %v1116_v50 = vpop.permute.xlu1 %1115  ;;  %v1114_v26 = vpop.permute.xlu0 %1113  ;;  %v1376_v3 = vsel %vm1354_vm1, %v1311_v32, %v2341_v15  ;;  %v1375_v51 = vsel %vm1354_vm1, %v1310_v33, %v2343_v2  ;;  %v290_v15 = vld [vmem:[%s2509_s23 + $0xc8] sm:$0xff]  ;;  %v289_v2 = vld [vmem:[%s2509_s23 + $0xc0] sm:$0xff]  ;;  %v1319_v25 = vsel %vm1289_vm0, %v294_v21, %v3125_v24  ;;  %v3131_v32 = vld [vmem:[#allocation47_spill] sm:$0xff] }
 0x19f   : > { %v1429_v56 = vsel %vm1419_vm2, %v1364_v60, %v1116_v50  ;;  %v1428_v52 = vsel %vm1419_vm2, %v1363_v0, %v1114_v26  ;;  %v1374_v50 = vsel %vm1354_vm1, %v1309_v28, %v2333_v23  ;;  %v1373_v26 = vsel %vm1354_vm1, %v1308_v29, %v2335_v18  ;;  %v288_v23 = vld [vmem:[%s2509_s23 + $0xb8] sm:$0xff]  ;;  %v287_v18 = vld [vmem:[%s2509_s23 + $0xb0] sm:$0xff]  ;;  %v3144_v24 = vld [vmem:[#allocation54_spill] sm:$0xff] }
 0x1a0   : > { %1493 = vst [vmem:[%s2540_s29 + $0x48] sm:$0xff] %v1429_v56  ;;  %1492 = vst [vmem:[%s2540_s29 + $0x40] sm:$0xff] %v1428_v52  ;;  %v1313_v36 = vsel %vm1289_vm0, %v288_v23, %v2087_v40  ;;  %v1312_v37 = vsel %vm1289_vm0, %v287_v18, %v2089_v41  ;;  %v1315_v40 = vsel %vm1289_vm0, %v290_v15, %v2095_v44  ;;  %v3121_v44 = vld [vmem:[#allocation5_spill] sm:$0xff]  ;;  %v3132_v23 = vld [vmem:[#allocation48_spill] sm:$0xff] }
 0x1a1   : > { %v1314_v41 = vsel %vm1289_vm0, %v289_v2, %v2097_v45  ;;  %v300_v15 = vld [vmem:[%s2509_s23 + $0x118] sm:$0xff]  ;;  %v299_v2 = vld [vmem:[%s2509_s23 + $0x110] sm:$0xff] }
 0x1a2   : > { %v1120_v61 = vpop.permute.xlu1 %1119  ;;  %v1118_v1 = vpop.permute.xlu0 %1117 }
 0x1a3   : > { %v1431_v11 = vsel %vm1419_vm2, %v1366_v6, %v1120_v61  ;;  %v1430_v49 = vsel %vm1419_vm2, %v1365_v62, %v1118_v1 }
 0x1a4   : > { %1495 = vst [vmem:[%s2540_s29 + $0x58] sm:$0xff] %v1431_v11  ;;  %1494 = vst [vmem:[%s2540_s29 + $0x50] sm:$0xff] %v1430_v49  ;;  %v1378_v11 = vsel %vm1354_vm1, %v1313_v36, %v2349_v7  ;;  %v1377_v49 = vsel %vm1354_vm1, %v1312_v37, %v2351_v54  ;;  %v292_v7 = vld [vmem:[%s2509_s23 + $0xd8] sm:$0xff]  ;;  %v291_v54 = vld [vmem:[%s2509_s23 + $0xd0] sm:$0xff] }
 0x1a5   : > { %v1317_v45 = vsel %vm1289_vm0, %v292_v7, %v3121_v44  ;;  %v3134_v36 = vld [vmem:[#allocation12_spill] sm:$0xff]  ;;  %v3137_v7 = vld [vmem:[#allocation13_spill] sm:$0xff] }
 0x1a6   : > { %v1124_v5 = vpop.permute.xlu1 %1123  ;;  %v1122_v34 = vpop.permute.xlu0 %1121  ;;  %v1382_v19 = vsel %vm1354_vm1, %v1317_v45, %v3123_v47  ;;  %v3140_v44 = vld [vmem:[#allocation52_spill] sm:$0xff]  ;;  %v3141_v47 = vld [vmem:[#allocation15_spill] sm:$0xff] }
 0x1a7   : > { %v1433_v35 = vsel %vm1419_vm2, %v1368_v43, %v1124_v5  ;;  %v1432_v48 = vsel %vm1419_vm2, %v1367_v4, %v1122_v34  ;;  %v1380_v43 = vsel %vm1354_vm1, %v1315_v40, %v2357_v63  ;;  %v1379_v4 = vsel %vm1354_vm1, %v1314_v41, %v2359_v46  ;;  %v293_v46 = vld [vmem:[%s2509_s23 + $0xe0] sm:$0xff] }
 0x1a8   : > { %1497 = vst [vmem:[%s2540_s29 + $0x68] sm:$0xff] %v1433_v35  ;;  %1496 = vst [vmem:[%s2540_s29 + $0x60] sm:$0xff] %v1432_v48  ;;  %v1316_v63 = vsel %vm1289_vm0, %v291_v54, %v3122_v20  ;;  %v1318_v59 = vsel %vm1289_vm0, %v293_v46, %v3126_v39  ;;  %v1325_v54 = vsel %vm1289_vm0, %v300_v15, %v3137_v7  ;;  %v3156_v7 = vld [vmem:[#allocation60_spill] sm:$0xff] }
 0x1aa   : > { %v1128_v22 = vpop.permute.xlu1 %1127  ;;  %v1126_v57 = vpop.permute.xlu0 %1125 }
 0x1ab   : > { %v1435_v14 = vsel %vm1419_vm2, %v1370_v53, %v1128_v22  ;;  %v1434_v30 = vsel %vm1419_vm2, %v1369_v38, %v1126_v57  ;;  %v3124_v53 = vld [vmem:[#allocation44_spill] sm:$0xff] }
 0x1ac   : > { %1499 = vst [vmem:[%s2540_s29 + $0x78] sm:$0xff] %v1435_v14  ;;  %1498 = vst [vmem:[%s2540_s29 + $0x70] sm:$0xff] %v1434_v30  ;;  %v1381_v38 = vsel %vm1354_vm1, %v1316_v63, %v3124_v53  ;;  %v3142_v53 = vld [vmem:[#allocation16_spill] sm:$0xff] }
 0x1ae   : > { %v1132_v27 = vpop.permute.xlu1 %1131  ;;  %v1130_v10 = vpop.permute.xlu0 %1129 }
 0x1af   : > { %v1437_v60 = vsel %vm1419_vm2, %v1372_v8, %v1132_v27  ;;  %v1436_v0 = vsel %vm1419_vm2, %v1371_v9, %v1130_v10  ;;  %v296_v8 = vld [vmem:[%s2509_s23 + $0xf8] sm:$0xff]  ;;  %v295_v9 = vld [vmem:[%s2509_s23 + $0xf0] sm:$0xff]  ;;  %v3127_v27 = vld [vmem:[#allocation45_spill] sm:$0xff] }
 0x1b0   : > { %1501 = vst [vmem:[%s2540_s29 + $0x88] sm:$0xff] %v1437_v60  ;;  %1500 = vst [vmem:[%s2540_s29 + $0x80] sm:$0xff] %v1436_v0  ;;  %v1384_v10 = vsel %vm1354_vm1, %v1319_v25, %v3127_v27  ;;  %v3128_v60 = vld [vmem:[#allocation46_spill] sm:$0xff]  ;;  %v3145_v27 = vld [vmem:[#allocation17_spill] sm:$0xff] }
 0x1b1   : > { %v1383_v0 = vsel %vm1354_vm1, %v1318_v59, %v3128_v60  ;;  %v3146_v60 = vld [vmem:[#allocation18_spill] sm:$0xff] }
 0x1b2   : > { %v1136_v56 = vpop.permute.xlu1 %1135  ;;  %v1134_v52 = vpop.permute.xlu0 %1133 }
 0x1b3   : > { %v1439_v12 = vsel %vm1419_vm2, %v1374_v50, %v1136_v56  ;;  %v1438_v13 = vsel %vm1419_vm2, %v1373_v26, %v1134_v52  ;;  %v3129_v50 = vld [vmem:[#allocation9_spill] sm:$0xff]  ;;  %v3130_v56 = vld [vmem:[#allocation10_spill] sm:$0xff] }
 0x1b4   : > { %1503 = vst [vmem:[%s2540_s29 + $0x98] sm:$0xff] %v1439_v12  ;;  %1502 = vst [vmem:[%s2540_s29 + $0x90] sm:$0xff] %v1438_v13  ;;  %v1321_v26 = vsel %vm1289_vm0, %v296_v8, %v3129_v50  ;;  %v1320_v52 = vsel %vm1289_vm0, %v295_v9, %v3130_v56  ;;  %v298_v12 = vld [vmem:[%s2509_s23 + $0x108] sm:$0xff]  ;;  %v297_v13 = vld [vmem:[%s2509_s23 + $0x100] sm:$0xff] }
 0x1b5   : > { %v1386_v33 = vsel %vm1354_vm1, %v1321_v26, %v3131_v32  ;;  %v1385_v18 = vsel %vm1354_vm1, %v1320_v52, %v3132_v23  ;;  %v1322_v37 = vsel %vm1289_vm0, %v297_v13, %v3134_v36  ;;  %v3148_v50 = vld [vmem:[#allocation56_spill] sm:$0xff]  ;;  %v3149_v32 = vld [vmem:[#allocation19_spill] sm:$0xff] }
 0x1b6   : > { %v1140_v6 = vpop.permute.xlu1 %1139  ;;  %v1138_v62 = vpop.permute.xlu0 %1137  ;;  %v3150_v23 = vld [vmem:[#allocation20_spill] sm:$0xff] }
 0x1b7   : > { %v1441_v61 = vsel %vm1419_vm2, %v1376_v3, %v1140_v6  ;;  %v1440_v1 = vsel %vm1419_vm2, %v1375_v51, %v1138_v62 }
 0x1b8   : > { %1505 = vst [vmem:[%s2540_s29 + $0xa8] sm:$0xff] %v1441_v61  ;;  %1504 = vst [vmem:[%s2540_s29 + $0xa0] sm:$0xff] %v1440_v1  ;;  %v3133_v61 = vld [vmem:[#allocation11_spill] sm:$0xff] }
 0x1b9   : > { %v1323_v1 = vsel %vm1289_vm0, %v298_v12, %v3133_v61  ;;  %v3152_v61 = vld [vmem:[#allocation58_spill] sm:$0xff] }
 0x1ba   : > { %v1144_v16 = vpop.permute.xlu1 %1143  ;;  %v1142_v17 = vpop.permute.xlu0 %1141 }
 0x1bb   : > { %v1443_v55 = vsel %vm1419_vm2, %v1378_v11, %v1144_v16  ;;  %v1442_v42 = vsel %vm1419_vm2, %v1377_v49, %v1142_v17  ;;  %v3135_v11 = vld [vmem:[#allocation49_spill] sm:$0xff]  ;;  %v3136_v16 = vld [vmem:[#allocation50_spill] sm:$0xff] }
 0x1bc   : > { %1507 = vst [vmem:[%s2540_s29 + $0xb8] sm:$0xff] %v1443_v55  ;;  %1506 = vst [vmem:[%s2540_s29 + $0xb0] sm:$0xff] %v1442_v42  ;;  %v1388_v49 = vsel %vm1354_vm1, %v1323_v1, %v3135_v11  ;;  %v1387_v17 = vsel %vm1354_vm1, %v1322_v37, %v3136_v16  ;;  %v3153_v11 = vld [vmem:[#allocation21_spill] sm:$0xff]  ;;  %v3154_v16 = vld [vmem:[#allocation22_spill] sm:$0xff] }
 0x1be   : > { %v1148_v5 = vpop.permute.xlu1 %1147  ;;  %v1146_v34 = vpop.permute.xlu0 %1145 }
 0x1bf   : > { %v1445_v35 = vsel %vm1419_vm2, %v1380_v43, %v1148_v5  ;;  %v1444_v48 = vsel %vm1419_vm2, %v1379_v4, %v1146_v34  ;;  %v3138_v43 = vld [vmem:[#allocation14_spill] sm:$0xff]  ;;  %v301_v34 = vld [vmem:[%s2509_s23 + $0x120] sm:$0xff] }
 0x1c0   : > { %1509 = vst [vmem:[%s2540_s29 + $0xc8] sm:$0xff] %v1445_v35  ;;  %1508 = vst [vmem:[%s2540_s29 + $0xc0] sm:$0xff] %v1444_v48  ;;  %v1324_v4 = vsel %vm1289_vm0, %v299_v2, %v3138_v43  ;;  %v302_v5 = vld [vmem:[%s2509_s23 + $0x128] sm:$0xff]  ;;  %v3139_v35 = vld [vmem:[#allocation51_spill] sm:$0xff] }
 0x1c1   : > { %v1390_v48 = vsel %vm1354_vm1, %v1325_v54, %v3139_v35  ;;  %v1389_v45 = vsel %vm1354_vm1, %v1324_v4, %v3140_v44  ;;  %v3157_v35 = vld [vmem:[#allocation23_spill] sm:$0xff]  ;;  %v3158_v44 = vld [vmem:[#allocation24_spill] sm:$0xff] }
 0x1c2   : > { %v1152_v22 = vpop.permute.xlu1 %1151  ;;  %v1150_v57 = vpop.permute.xlu0 %1149 }
 0x1c3   : > { %v1447_v14 = vsel %vm1419_vm2, %v1382_v19, %v1152_v22  ;;  %v1446_v30 = vsel %vm1419_vm2, %v1381_v38, %v1150_v57  ;;  %v1327_v19 = vsel %vm1289_vm0, %v302_v5, %v3141_v47  ;;  %v1326_v38 = vsel %vm1289_vm0, %v301_v34, %v3142_v53  ;;  %v304_v22 = vld [vmem:[%s2509_s23 + $0x138] sm:$0xff]  ;;  %v303_v57 = vld [vmem:[%s2509_s23 + $0x130] sm:$0xff]  ;;  %v3160_v47 = vld [vmem:[#allocation62_spill] sm:$0xff] }
 0x1c4   : > { %1511 = vst [vmem:[%s2540_s29 + $0xd8] sm:$0xff] %v1447_v14  ;;  %1510 = vst [vmem:[%s2540_s29 + $0xd0] sm:$0xff] %v1446_v30  ;;  %v3143_v14 = vld [vmem:[#allocation53_spill] sm:$0xff]  ;;  %v1391_v25 = vsel %vm1354_vm1, %v1326_v38, %v3144_v24  ;;  %v3162_v24 = vld [vmem:[#allocation26_spill] sm:$0xff] }
 0x1c5   : > { %v1392_v30 = vsel %vm1354_vm1, %v1327_v19, %v3143_v14  ;;  %v3161_v14 = vld [vmem:[#allocation25_spill] sm:$0xff] }
 0x1c6   : > { %v1156_v28 = vpop.permute.xlu1 %1155  ;;  %v1154_v29 = vpop.permute.xlu0 %1153 }
 0x1c7   : > { %v1449_v31 = vsel %vm1419_vm2, %v1384_v10, %v1156_v28  ;;  %v1448_v58 = vsel %vm1419_vm2, %v1383_v0, %v1154_v29  ;;  %v1329_v10 = vsel %vm1289_vm0, %v304_v22, %v3145_v27  ;;  %v1328_v0 = vsel %vm1289_vm0, %v303_v57, %v3146_v60  ;;  %v306_v28 = vld [vmem:[%s2509_s23 + $0x148] sm:$0xff]  ;;  %v305_v29 = vld [vmem:[%s2509_s23 + $0x140] sm:$0xff]  ;;  %v3164_v27 = vld [vmem:[#allocation64_spill] sm:$0xff] }
 0x1c8   : > { %1513 = vst [vmem:[%s2540_s29 + $0xe8] sm:$0xff] %v1449_v31  ;;  %1512 = vst [vmem:[%s2540_s29 + $0xe0] sm:$0xff] %v1448_v58  ;;  %v3147_v31 = vld [vmem:[#allocation55_spill] sm:$0xff]  ;;  %v1393_v26 = vsel %vm1354_vm1, %v1328_v0, %v3148_v50  ;;  %v3166_v50 = vld [vmem:[#allocation28_spill] sm:$0xff] }
 0x1c9   : > { %v1394_v58 = vsel %vm1354_vm1, %v1329_v10, %v3147_v31  ;;  %v3165_v31 = vld [vmem:[#allocation27_spill] sm:$0xff] }
 0x1ca   : > { %v1160_v3 = vpop.permute.xlu1 %1159  ;;  %v1158_v51 = vpop.permute.xlu0 %1157 }
 0x1cb   : > { %v1451_v6 = vsel %vm1419_vm2, %v1386_v33, %v1160_v3  ;;  %v1450_v62 = vsel %vm1419_vm2, %v1385_v18, %v1158_v51  ;;  %v1331_v33 = vsel %vm1289_vm0, %v306_v28, %v3149_v32  ;;  %v1330_v18 = vsel %vm1289_vm0, %v305_v29, %v3150_v23  ;;  %v308_v3 = vld [vmem:[%s2509_s23 + $0x158] sm:$0xff]  ;;  %v307_v51 = vld [vmem:[%s2509_s23 + $0x150] sm:$0xff]  ;;  %v3168_v32 = vld [vmem:[#allocation66_spill] sm:$0xff] }
 0x1cc   : > { %1515 = vst [vmem:[%s2540_s29 + $0xf8] sm:$0xff] %v1451_v6  ;;  %1514 = vst [vmem:[%s2540_s29 + $0xf0] sm:$0xff] %v1450_v62  ;;  %v3151_v6 = vld [vmem:[#allocation57_spill] sm:$0xff]  ;;  %v1395_v1 = vsel %vm1354_vm1, %v1330_v18, %v3152_v61  ;;  %v3170_v61 = vld [vmem:[#allocation30_spill] sm:$0xff] }
 0x1cd   : > { %v1396_v62 = vsel %vm1354_vm1, %v1331_v33, %v3151_v6  ;;  %v3169_v6 = vld [vmem:[#allocation29_spill] sm:$0xff] }
 0x1ce   : > { %v1164_v55 = vpop.permute.xlu1 %1163  ;;  %v1162_v42 = vpop.permute.xlu0 %1161 }
 0x1cf   : > { %v1453_v40 = vsel %vm1419_vm2, %v1388_v49, %v1164_v55  ;;  %v1452_v41 = vsel %vm1419_vm2, %v1387_v17, %v1162_v42  ;;  %v1333_v49 = vsel %vm1289_vm0, %v308_v3, %v3153_v11  ;;  %v1332_v17 = vsel %vm1289_vm0, %v307_v51, %v3154_v16  ;;  %v310_v55 = vld [vmem:[%s2509_s23 + $0x168] sm:$0xff]  ;;  %v309_v42 = vld [vmem:[%s2509_s23 + $0x160] sm:$0xff]  ;;  %v3172_v11 = vld [vmem:[#allocation68_spill] sm:$0xff] }
 0x1d0   : > { %1517 = vst [vmem:[%s2540_s29 + $0x108] sm:$0xff] %v1453_v40  ;;  %1516 = vst [vmem:[%s2540_s29 + $0x100] sm:$0xff] %v1452_v41  ;;  %v3155_v40 = vld [vmem:[#allocation59_spill] sm:$0xff]  ;;  %v1397_v54 = vsel %vm1354_vm1, %v1332_v17, %v3156_v7  ;;  %v3174_v7 = vld [vmem:[#allocation32_spill] sm:$0xff] }
 0x1d1   : > { %v1398_v41 = vsel %vm1354_vm1, %v1333_v49, %v3155_v40  ;;  %v3173_v40 = vld [vmem:[#allocation31_spill] sm:$0xff] }
 0x1d2   : > { %v1168_v20 = vpop.permute.xlu1 %1167  ;;  %v1166_v63 = vpop.permute.xlu0 %1165 }
 0x1d3   : > { %v1455_v21 = vsel %vm1419_vm2, %v1390_v48, %v1168_v20  ;;  %v1454_v46 = vsel %vm1419_vm2, %v1389_v45, %v1166_v63  ;;  %v1335_v48 = vsel %vm1289_vm0, %v310_v55, %v3157_v35  ;;  %v1334_v45 = vsel %vm1289_vm0, %v309_v42, %v3158_v44  ;;  %v312_v20 = vld [vmem:[%s2509_s23 + $0x178] sm:$0xff]  ;;  %v311_v63 = vld [vmem:[%s2509_s23 + $0x170] sm:$0xff]  ;;  %v3176_v35 = vld [vmem:[#allocation70_spill] sm:$0xff] }
 0x1d4   : > { %1519 = vst [vmem:[%s2540_s29 + $0x118] sm:$0xff] %v1455_v21  ;;  %1518 = vst [vmem:[%s2540_s29 + $0x110] sm:$0xff] %v1454_v46  ;;  %v3159_v21 = vld [vmem:[#allocation61_spill] sm:$0xff]  ;;  %v1399_v19 = vsel %vm1354_vm1, %v1334_v45, %v3160_v47  ;;  %v3178_v47 = vld [vmem:[#allocation34_spill] sm:$0xff] }
 0x1d5   : > { %v1400_v46 = vsel %vm1354_vm1, %v1335_v48, %v3159_v21  ;;  %v3177_v21 = vld [vmem:[#allocation33_spill] sm:$0xff] }
 0x1d6   : > { %v1172_v39 = vpop.permute.xlu1 %1171  ;;  %v1170_v59 = vpop.permute.xlu0 %1169 }
 0x1d7   : > { %v1457_v8 = vsel %vm1419_vm2, %v1392_v30, %v1172_v39  ;;  %v1456_v9 = vsel %vm1419_vm2, %v1391_v25, %v1170_v59  ;;  %v1337_v30 = vsel %vm1289_vm0, %v312_v20, %v3161_v14  ;;  %v1336_v25 = vsel %vm1289_vm0, %v311_v63, %v3162_v24  ;;  %v314_v39 = vld [vmem:[%s2509_s23 + $0x188] sm:$0xff]  ;;  %v313_v59 = vld [vmem:[%s2509_s23 + $0x180] sm:$0xff]  ;;  %v3180_v14 = vld [vmem:[#allocation72_spill] sm:$0xff] }
 0x1d8   : > { %1521 = vst [vmem:[%s2540_s29 + $0x128] sm:$0xff] %v1457_v8  ;;  %1520 = vst [vmem:[%s2540_s29 + $0x120] sm:$0xff] %v1456_v9  ;;  %v3163_v8 = vld [vmem:[#allocation63_spill] sm:$0xff]  ;;  %v1401_v10 = vsel %vm1354_vm1, %v1336_v25, %v3164_v27  ;;  %v3182_v27 = vld [vmem:[#allocation36_spill] sm:$0xff] }
 0x1d9   : > { %v1402_v9 = vsel %vm1354_vm1, %v1337_v30, %v3163_v8  ;;  %v3181_v8 = vld [vmem:[#allocation35_spill] sm:$0xff] }
 0x1da   : > { %v1176_v56 = vpop.permute.xlu1 %1175  ;;  %v1174_v52 = vpop.permute.xlu0 %1173 }
 0x1db   : > { %v1459_v12 = vsel %vm1419_vm2, %v1394_v58, %v1176_v56  ;;  %v1458_v13 = vsel %vm1419_vm2, %v1393_v26, %v1174_v52  ;;  %v1339_v58 = vsel %vm1289_vm0, %v314_v39, %v3165_v31  ;;  %v1338_v26 = vsel %vm1289_vm0, %v313_v59, %v3166_v50  ;;  %v316_v56 = vld [vmem:[%s2509_s23 + $0x198] sm:$0xff]  ;;  %v315_v52 = vld [vmem:[%s2509_s23 + $0x190] sm:$0xff]  ;;  %v3184_v31 = vld [vmem:[#allocation74_spill] sm:$0xff] }
 0x1dc   : > { %1523 = vst [vmem:[%s2540_s29 + $0x138] sm:$0xff] %v1459_v12  ;;  %1522 = vst [vmem:[%s2540_s29 + $0x130] sm:$0xff] %v1458_v13  ;;  %v3167_v12 = vld [vmem:[#allocation65_spill] sm:$0xff]  ;;  %v1403_v33 = vsel %vm1354_vm1, %v1338_v26, %v3168_v32  ;;  %v3186_v32 = vld [vmem:[#allocation38_spill] sm:$0xff] }
 0x1dd   : > { %v1404_v13 = vsel %vm1354_vm1, %v1339_v58, %v3167_v12  ;;  %v3185_v12 = vld [vmem:[#allocation37_spill] sm:$0xff] }
 0x1de   : > { %v1180_v36 = vpop.permute.xlu1 %1179  ;;  %v1178_v37 = vpop.permute.xlu0 %1177 }
 0x1df   : > { %v1461_v15 = vsel %vm1419_vm2, %v1396_v62, %v1180_v36  ;;  %v1460_v2 = vsel %vm1419_vm2, %v1395_v1, %v1178_v37  ;;  %v1341_v62 = vsel %vm1289_vm0, %v316_v56, %v3169_v6  ;;  %v1340_v1 = vsel %vm1289_vm0, %v315_v52, %v3170_v61  ;;  %v318_v36 = vld [vmem:[%s2509_s23 + $0x1a8] sm:$0xff]  ;;  %v317_v37 = vld [vmem:[%s2509_s23 + $0x1a0] sm:$0xff]  ;;  %v3188_v6 = vld [vmem:[#allocation76_spill] sm:$0xff] }
 0x1e0   : > { %1525 = vst [vmem:[%s2540_s29 + $0x148] sm:$0xff] %v1461_v15  ;;  %1524 = vst [vmem:[%s2540_s29 + $0x140] sm:$0xff] %v1460_v2  ;;  %v3171_v15 = vld [vmem:[#allocation67_spill] sm:$0xff]  ;;  %v1405_v49 = vsel %vm1354_vm1, %v1340_v1, %v3172_v11  ;;  %v3190_v11 = vld [vmem:[#allocation40_spill] sm:$0xff] }
 0x1e1   : > { %v1406_v2 = vsel %vm1354_vm1, %v1341_v62, %v3171_v15  ;;  %v3189_v15 = vld [vmem:[#allocation39_spill] sm:$0xff] }
 0x1e2   : > { %v1184_v43 = vpop.permute.xlu1 %1183  ;;  %v1182_v4 = vpop.permute.xlu0 %1181 }
 0x1e3   : > { %v1463_v5 = vsel %vm1419_vm2, %v1398_v41, %v1184_v43  ;;  %v1462_v34 = vsel %vm1419_vm2, %v1397_v54, %v1182_v4  ;;  %v1343_v41 = vsel %vm1289_vm0, %v318_v36, %v3173_v40  ;;  %v1342_v54 = vsel %vm1289_vm0, %v317_v37, %v3174_v7  ;;  %v320_v43 = vld [vmem:[%s2509_s23 + $0x1b8] sm:$0xff]  ;;  %v319_v4 = vld [vmem:[%s2509_s23 + $0x1b0] sm:$0xff]  ;;  %v3192_v40 = vld [vmem:[#allocation78_spill] sm:$0xff] }
 0x1e4   : > { %1527 = vst [vmem:[%s2540_s29 + $0x158] sm:$0xff] %v1463_v5  ;;  %1526 = vst [vmem:[%s2540_s29 + $0x150] sm:$0xff] %v1462_v34  ;;  %v3175_v5 = vld [vmem:[#allocation69_spill] sm:$0xff]  ;;  %v1407_v48 = vsel %vm1354_vm1, %v1342_v54, %v3176_v35  ;;  %v3194_v35 = vld [vmem:[#allocation42_spill] sm:$0xff] }
 0x1e5   : > { %v1408_v34 = vsel %vm1354_vm1, %v1343_v41, %v3175_v5  ;;  %v3193_v5 = vld [vmem:[#allocation41_spill] sm:$0xff] }
 0x1e6   : > { %v1188_v53 = vpop.permute.xlu1 %1187  ;;  %v1186_v38 = vpop.permute.xlu0 %1185 }
 0x1e7   : > { %v1465_v22 = vsel %vm1419_vm2, %v1400_v46, %v1188_v53  ;;  %v1464_v57 = vsel %vm1419_vm2, %v1399_v19, %v1186_v38  ;;  %v1345_v46 = vsel %vm1289_vm0, %v320_v43, %v3177_v21  ;;  %v1344_v19 = vsel %vm1289_vm0, %v319_v4, %v3178_v47  ;;  %v322_v53 = vld [vmem:[%s2509_s23 + $0x1c8] sm:$0xff]  ;;  %v321_v38 = vld [vmem:[%s2509_s23 + $0x1c0] sm:$0xff] }
 0x1e8   : > { %1529 = vst [vmem:[%s2540_s29 + $0x168] sm:$0xff] %v1465_v22  ;;  %1528 = vst [vmem:[%s2540_s29 + $0x160] sm:$0xff] %v1464_v57  ;;  %v3179_v22 = vld [vmem:[#allocation71_spill] sm:$0xff]  ;;  %v1409_v30 = vsel %vm1354_vm1, %v1344_v19, %v3180_v14 }
 0x1e9   : > { %v1410_v57 = vsel %vm1354_vm1, %v1345_v46, %v3179_v22 }
 0x1ea   : > { %v1192_v60 = vpop.permute.xlu1 %1191  ;;  %v1190_v0 = vpop.permute.xlu0 %1189 }
 0x1eb   : > { %v1467_v28 = vsel %vm1419_vm2, %v1402_v9, %v1192_v60  ;;  %v1466_v29 = vsel %vm1419_vm2, %v1401_v10, %v1190_v0  ;;  %v1347_v9 = vsel %vm1289_vm0, %v322_v53, %v3181_v8  ;;  %v1346_v10 = vsel %vm1289_vm0, %v321_v38, %v3182_v27  ;;  %v324_v60 = vld [vmem:[%s2509_s23 + $0x1d8] sm:$0xff]  ;;  %v323_v0 = vld [vmem:[%s2509_s23 + $0x1d0] sm:$0xff] }
 0x1ec   : > { %1531 = vst [vmem:[%s2540_s29 + $0x178] sm:$0xff] %v1467_v28  ;;  %1530 = vst [vmem:[%s2540_s29 + $0x170] sm:$0xff] %v1466_v29  ;;  %v3183_v28 = vld [vmem:[#allocation73_spill] sm:$0xff]  ;;  %v1411_v58 = vsel %vm1354_vm1, %v1346_v10, %v3184_v31 }
 0x1ed   : > { %v1412_v29 = vsel %vm1354_vm1, %v1347_v9, %v3183_v28 }
 0x1ee   : > { %v1196_v23 = vpop.permute.xlu1 %1195  ;;  %v1194_v18 = vpop.permute.xlu0 %1193 }
 0x1ef   : > { %v1469_v3 = vsel %vm1419_vm2, %v1404_v13, %v1196_v23  ;;  %v1468_v51 = vsel %vm1419_vm2, %v1403_v33, %v1194_v18  ;;  %v1349_v13 = vsel %vm1289_vm0, %v324_v60, %v3185_v12  ;;  %v1348_v33 = vsel %vm1289_vm0, %v323_v0, %v3186_v32  ;;  %v326_v23 = vld [vmem:[%s2509_s23 + $0x1e8] sm:$0xff]  ;;  %v325_v18 = vld [vmem:[%s2509_s23 + $0x1e0] sm:$0xff] }
 0x1f0   : > { %1533 = vst [vmem:[%s2540_s29 + $0x188] sm:$0xff] %v1469_v3  ;;  %1532 = vst [vmem:[%s2540_s29 + $0x180] sm:$0xff] %v1468_v51  ;;  %v3187_v3 = vld [vmem:[#allocation75_spill] sm:$0xff]  ;;  %v1413_v62 = vsel %vm1354_vm1, %v1348_v33, %v3188_v6 }
 0x1f1   : > { %v1414_v51 = vsel %vm1354_vm1, %v1349_v13, %v3187_v3 }
 0x1f2   : > { %v1200_v16 = vpop.permute.xlu1 %1199  ;;  %v1198_v17 = vpop.permute.xlu0 %1197 }
 0x1f3   : > { %v1471_v55 = vsel %vm1419_vm2, %v1406_v2, %v1200_v16  ;;  %v1470_v42 = vsel %vm1419_vm2, %v1405_v49, %v1198_v17  ;;  %v1351_v2 = vsel %vm1289_vm0, %v326_v23, %v3189_v15  ;;  %v1350_v49 = vsel %vm1289_vm0, %v325_v18, %v3190_v11  ;;  %v328_v16 = vld [vmem:[%s2509_s23 + $0x1f8] sm:$0xff]  ;;  %v327_v17 = vld [vmem:[%s2509_s23 + $0x1f0] sm:$0xff] }
 0x1f4   : > { %1535 = vst [vmem:[%s2540_s29 + $0x198] sm:$0xff] %v1471_v55  ;;  %1534 = vst [vmem:[%s2540_s29 + $0x190] sm:$0xff] %v1470_v42  ;;  %v3191_v55 = vld [vmem:[#allocation77_spill] sm:$0xff]  ;;  %v1415_v41 = vsel %vm1354_vm1, %v1350_v49, %v3192_v40 }
 0x1f5   : > { %v1416_v42 = vsel %vm1354_vm1, %v1351_v2, %v3191_v55 }
 0x1f6   : > { %v1204_v44 = vpop.permute.xlu1 %1203  ;;  %v1202_v45 = vpop.permute.xlu0 %1201 }
 0x1f7   : > { %v1473_v20 = vsel %vm1419_vm2, %v1408_v34, %v1204_v44  ;;  %v1472_v63 = vsel %vm1419_vm2, %v1407_v48, %v1202_v45  ;;  %v1353_v34 = vsel %vm1289_vm0, %v328_v16, %v3193_v5  ;;  %v1352_v48 = vsel %vm1289_vm0, %v327_v17, %v3194_v35  ;;  %v3195_v44 = vld [vmem:[#allocation79_spill] sm:$0xff] }
 0x1f8   : > { %1537 = vst [vmem:[%s2540_s29 + $0x1a8] sm:$0xff] %v1473_v20  ;;  %1536 = vst [vmem:[%s2540_s29 + $0x1a0] sm:$0xff] %v1472_v63  ;;  %v1418_v45 = vsel %vm1354_vm1, %v1353_v34, %v3195_v44  ;;  %v3196_v20 = vld [vmem:[#allocation80_spill] sm:$0xff] }
 0x1f9   : > { %v1417_v63 = vsel %vm1354_vm1, %v1352_v48, %v3196_v20 }
 0x1fa   : > { %v1208_v24 = vpop.permute.xlu1 %1207  ;;  %v1206_v25 = vpop.permute.xlu0 %1205 }
 0x1fb   : > { %v1475_v39 = vsel %vm1419_vm2, %v1410_v57, %v1208_v24  ;;  %v1474_v59 = vsel %vm1419_vm2, %v1409_v30, %v1206_v25 }
 0x1fc   : > { %1539 = vst [vmem:[%s2540_s29 + $0x1b8] sm:$0xff] %v1475_v39  ;;  %1538 = vst [vmem:[%s2540_s29 + $0x1b0] sm:$0xff] %v1474_v59 }
 0x1fe   : > { %v1212_v50 = vpop.permute.xlu1 %1211  ;;  %v1210_v26 = vpop.permute.xlu0 %1209 }
 0x1ff   : > { %v1477_v56 = vsel %vm1419_vm2, %v1412_v29, %v1212_v50  ;;  %v1476_v52 = vsel %vm1419_vm2, %v1411_v58, %v1210_v26 }
 0x200   : > { %1541 = vst [vmem:[%s2540_s29 + $0x1c8] sm:$0xff] %v1477_v56  ;;  %1540 = vst [vmem:[%s2540_s29 + $0x1c0] sm:$0xff] %v1476_v52 }
 0x202   : > { %v1216_v61 = vpop.permute.xlu1 %1215  ;;  %v1214_v1 = vpop.permute.xlu0 %1213 }
 0x203   : > { %v1479_v36 = vsel %vm1419_vm2, %v1414_v51, %v1216_v61  ;;  %v1478_v37 = vsel %vm1419_vm2, %v1413_v62, %v1214_v1 }
 0x204   : > { %1543 = vst [vmem:[%s2540_s29 + $0x1d8] sm:$0xff] %v1479_v36  ;;  %1542 = vst [vmem:[%s2540_s29 + $0x1d0] sm:$0xff] %v1478_v37 }
 0x206   : > { %v1220_v7 = vpop.permute.xlu1 %1219  ;;  %v1218_v54 = vpop.permute.xlu0 %1217 }
 0x207   : > { %v1481_v43 = vsel %vm1419_vm2, %v1416_v42, %v1220_v7  ;;  %v1480_v4 = vsel %vm1419_vm2, %v1415_v41, %v1218_v54 }
 0x208   : > { %1545 = vst [vmem:[%s2540_s29 + $0x1e8] sm:$0xff] %v1481_v43  ;;  %1544 = vst [vmem:[%s2540_s29 + $0x1e0] sm:$0xff] %v1480_v4 }
 0x20a   : > { %v1224_v21 = vpop.permute.xlu1 %1223  ;;  %v1222_v46 = vpop.permute.xlu0 %1221 }
 0x20b   : > { %v1483_v47 = vsel %vm1419_vm2, %v1418_v45, %v1224_v21  ;;  %v1482_v19 = vsel %vm1419_vm2, %v1417_v63, %v1222_v46 }
 0x20c   : > { %1547 = vst [vmem:[%s2540_s29 + $0x1f8] sm:$0xff] %v1483_v47  ;;  %1546 = vst [vmem:[%s2540_s29 + $0x1f0] sm:$0xff] %v1482_v19 }
 0x20d   : > { %1736 = shalt.err (!%p1733_p3)
}
 0x20e   : > { %s1737_s13 = scalar_lea.hbm %s2983_s19, 8192  ;;  %s1741_s22 = scalar_lea.hbm %s3042_s4, 32768 }
 0x20f   : > { %p1738_p4 = scmp.ne.s32.totalorder %s2983_s19, %s1737_s13  ;;  %p1742_p9 = scmp.lt.u32.totalorder %s2983_s19, %s3042_s4 }
 0x210   : > { %p1743_p10 = scmp.lt.u32.totalorder %s1741_s22, %s1737_s13  ;;  %p1745_p12 = scmp.lt.u32.totalorder %s1737_s13, %s2983_s19 }
 0x211   : > { %p1739_p7 = pnand %p1738_p4, %p1856_p5 }
 0x212   : > { %p1744_p11 = por %p1743_p10, %p1742_p9 }
 0x213   : > { %p1740_p8 = pneg %p1739_p7 }
 0x214   : > { %p1746_p13 = por %p1745_p12, %p1744_p11 }
 0x216   : > { %p1747_p0 = pnand %p1746_p13, %p1740_p8 }
 0x218   : > { %1750 = shalt.err (!%p1747_p0)
}
 0x219   : > { %s1791_s28 = smov 128   ;;  %s1792_s29 = smov 8  }
 0x21a   : > { %1679 = dma.vmem_to_hbm [thread:$0]  (%p1856_p5), %s2985_s5, 8192, %s2983_s19, %s2997_s8, %s1791_s28, %s1791_s28, %s1792_s29  }
 0x21b PF: > { %p1685_p1 = scmp.ge.s32.totalorder %s1785_s18, 2  ;;  %s1577_s30 = sand.u32 1, %s1773_s15  }
 0x21c   : > { %s1578_s6 = scalar_lea.sflag [#allocation3], %s1577_s30 }
 0x21d   : > { %p1682_p2 = pnand %p1685_p1, %p1860_p6 }
 0x21f   : > { %1768 = dma.done.wait (!%p1682_p2), %s1578_s6, 8192  }
 0x220   : > { %1770 = vsyncadd (!%p1682_p2), %s1578_s6, 4294959104  ;;  %p14_p3 = scmp.ge.s32.totalorder %s1843_s21, 6   ;;  %s3197_s15 = smov %s1777_s16 }
 0x221   : > { %s3198_s16 = smov %s1781_s17  ;;  %s3199_s17 = smov %s1854_s24 }
 0x222   : > { %s3200_s18 = smov %s1843_s21  ;;  %16 = sbr.rel (!%p14_p3) target bundleno = 3 (0x3), region = 80 }
 0x229   :  { %1583 = vsyncpa [#allocation3], 1 }
 0x22a   :  { %1585 = vsyncpa [#allocation3 + $0x1], 1 }

</bundles_post_ra>
